<compile_context>
chip_gen: v6e
topology: v6e:2x2x1
jax: 0.10.0
libtpu: 0.0.40
codegen_flags: <defaults>
</compile_context>

<pallas_src>
import jax
import jax.numpy as jnp
from jax.experimental import pallas as pl
from jax.experimental.pallas import tpu as pltpu


def _leaky_relu(x, slope=0.01):
    # nn.LeakyReLU default negative_slope = 0.01
    return jnp.where(x >= 0, x, slope * x)


# ----------------------------- fused Generator kernel -----------------------------

def _make_generator_kernel(T, B, D, H, L, res1):
    """B here is the sublane-padded batch (multiple of 8)."""

    def kernel(*refs):
        z_ref, z0_ref = refs[0], refs[1]                       # (T*B, D), (B, D)
        w1_ref, b1_ref, w2_ref, b2_ref, w3_ref, b3_ref = refs[2:8]   # merged ResFNN heads
        w_ih0_ref, w_hh0_ref, b0_ref = refs[8], refs[9], refs[10]    # LSTM layer 0
        upper = refs[11:11 + 2 * (L - 1)]                      # (w_cat, b) per layer l>0
        w_out_ref = refs[11 + 2 * (L - 1)]                     # (H, O_pad), lane-dense
        o_ref = refs[12 + 2 * (L - 1)]                         # (T*B, O_pad)
        zp_buf = refs[13 + 2 * (L - 1)]                        # (T*B, 4H) scratch
        hbuf = refs[14 + 2 * (L - 1)]                          # (T*B, H) scratch

        f32 = jnp.float32

        # ---- prologue: merged ResFNN heads -> h0 / c0 kept as values ---------
        z0 = z0_ref[...]
        y = _leaky_relu(jnp.dot(z0, w1_ref[...], preferred_element_type=f32)
                        + b1_ref[...])
        if res1:  # residual only when input_dim == hidden_dim
            y = jnp.concatenate([z0, z0], axis=-1) + y
        y = y + _leaky_relu(jnp.dot(y, w2_ref[...], preferred_element_type=f32)
                            + b2_ref[...])
        hc = jnp.tanh(jnp.dot(jnp.tanh(y), w3_ref[...], preferred_element_type=f32)
                      + b3_ref[...])                            # (B, 2*L*H)
        h = [hc[:, l * H:(l + 1) * H] for l in range(L)]
        c = [hc[:, (L + l) * H:(L + l + 1) * H] for l in range(L)]

        # ---- hoist layer-0 input projection (bias folded in) over all steps --
        zp_buf[...] = (jnp.dot(z_ref[...], w_ih0_ref[...], preferred_element_type=f32)
                       + b0_ref[...])                           # (T*B, 4H)

        # ---- hoist weight / bias loads out of the unrolled recurrence --------
        w_hh0 = w_hh0_ref[...]
        w_cat = [upper[2 * (l - 1)][...] for l in range(1, L)]           # (2H, 4H)
        b_up = [jnp.broadcast_to(upper[2 * (l - 1) + 1][...], (B, 4 * H))
                for l in range(1, L)]
        w_out = w_out_ref[...]

        # ---- recurrence: state in vregs, loop fully unrolled (T, L small) ----
        for t in range(T):
            x = None
            for l in range(L):
                h_prev, c_prev = h[l], c[l]
                if l == 0:
                    gates = (zp_buf[t * B:(t + 1) * B, :]
                             + jnp.dot(h_prev, w_hh0, preferred_element_type=f32))
                else:
                    xh = jnp.concatenate([x, h_prev], axis=-1)            # (B, 2H)
                    gates = (jnp.dot(xh, w_cat[l - 1], preferred_element_type=f32)
                             + b_up[l - 1])
                # full-width nonlinearities, quarter-width lane slices (i,f,g,o)
                sg = jax.nn.sigmoid(gates)
                tg = jnp.tanh(gates)
                i = sg[:, 0:H]
                f = sg[:, H:2 * H]
                g = tg[:, 2 * H:3 * H]
                o = sg[:, 3 * H:4 * H]
                c_new = f * c_prev + i * g
                h_new = o * jnp.tanh(c_new)
                h[l] = h_new
                c[l] = c_new
                x = h_new
            hbuf[t * B:(t + 1) * B, :] = jnp.tanh(x)            # tanh at step time

        # ---- epilogue: lane-dense bias-free Linear, one dense matmul ----------
        o_ref[...] = jnp.dot(hbuf[...], w_out, preferred_element_type=f32)

    return kernel


def _pack_params(params, H, L, O, O_pad):
    """Host-side packing: merge the two ResFNN heads, fuse LSTM w_ih/w_hh for
    layers l>0, and zero-pad W_out to a lane-dense width."""
    nn_h = params['initial_nn']
    nn_c = params['initial_nn1']

    def block_diag(a, b):
        r1, c1 = a.shape
        r2, c2 = b.shape
        return jnp.concatenate([
            jnp.concatenate([a, jnp.zeros((r1, c2), a.dtype)], axis=1),
            jnp.concatenate([jnp.zeros((r2, c1), b.dtype), b], axis=1)], axis=0)

    w1 = jnp.concatenate([nn_h[0], nn_c[0]], axis=1)            # (D, 2*hid)
    b1 = jnp.concatenate([nn_h[1], nn_c[1]], axis=1)
    w2 = block_diag(nn_h[2], nn_c[2])                           # (2*hid, 2*hid)
    b2 = jnp.concatenate([nn_h[3], nn_c[3]], axis=1)
    w3 = block_diag(nn_h[4], nn_c[4])                           # (2*hid, 2*L*H)
    b3 = jnp.concatenate([nn_h[5], nn_c[5]], axis=1)

    packed = [w1, b1, w2, b2, w3, b3]

    w_ih0, w_hh0, b0 = params['lstm'][0]
    packed += [w_ih0, w_hh0, b0]
    for l in range(1, L):
        w_ih, w_hh, b = params['lstm'][l]
        packed += [jnp.concatenate([w_ih, w_hh], axis=0), b]    # (2H, 4H), (1, 4H)

    w_out = params['w_out']
    if O_pad != O:
        w_out = jnp.pad(w_out, ((0, 0), (0, O_pad - O)))
    packed.append(w_out)
    return packed


def generator_pallas(params, z_tm, z0):
    """z_tm: (T, B, D) time-major noise; z0: (B, D). Returns (T, B, out_dim)."""
    T, B, D = z_tm.shape
    L = len(params['lstm'])
    H, O = params['w_out'].shape
    res1 = (D == H)                          # ResidualBlock(input_dim, hidden) residual

    B_pad = max(8, ((B + 7) // 8) * 8)       # full sublane tile
    O_pad = max(128, ((O + 127) // 128) * 128)  # lane-dense output

    if B_pad != B:
        z_tm = jnp.pad(z_tm, ((0, 0), (0, B_pad - B), (0, 0)))
        z0 = jnp.pad(z0, ((0, B_pad - B), (0, 0)))

    inputs = [z_tm.reshape(T * B_pad, D), z0] + _pack_params(params, H, L, O, O_pad)

    kernel = _make_generator_kernel(T, B_pad, D, H, L, res1)
    out_flat = pl.pallas_call(
        kernel,
        out_shape=jax.ShapeDtypeStruct((T * B_pad, O_pad), jnp.float32),
        scratch_shapes=[
            pltpu.VMEM((T * B_pad, 4 * H), jnp.float32),   # hoisted layer-0 input proj
            pltpu.VMEM((T * B_pad, H), jnp.float32),       # per-step tanh(last-layer h)
        ],
    )(*inputs)
    # TODO(synk): for large T*B add a batch/time grid (2nd TC on v7x, VMEM ceiling).
    return out_flat.reshape(T, B_pad, O_pad)[:, :B, :O]


# --------------------------- parameters & Generator forward ---------------------------

def init_generator_params(key, input_dim, output_dim, hidden_dim, n_layers):
    keys = iter(jax.random.split(key, 64))

    def uniform(k, shape, fan_in):
        bound = 1.0 / float(fan_in) ** 0.5
        return jax.random.uniform(k, shape, jnp.float32, -bound, bound)

    def linear(in_d, out_d, bias=True):
        w = uniform(next(keys), (in_d, out_d), in_d)          # stored as (in, out)
        b = uniform(next(keys), (1, out_d), in_d) if bias else None
        return w, b

    def resfnn_params(in_d):
        w1, b1 = linear(in_d, hidden_dim)
        w2, b2 = linear(hidden_dim, hidden_dim)
        w3, b3 = linear(hidden_dim, hidden_dim * n_layers)    # (hid, L*H), (1, L*H)
        return (w1, b1, w2, b2, w3, b3)

    lstm = []
    for l in range(n_layers):
        in_d = input_dim if l == 0 else hidden_dim
        w_ih = uniform(next(keys), (in_d, 4 * hidden_dim), hidden_dim)
        w_hh = uniform(next(keys), (hidden_dim, 4 * hidden_dim), hidden_dim)
        b_ih = uniform(next(keys), (1, 4 * hidden_dim), hidden_dim)
        b_hh = uniform(next(keys), (1, 4 * hidden_dim), hidden_dim)
        lstm.append((w_ih, w_hh, b_ih + b_hh))                 # fold the two biases
    w_out, _ = linear(hidden_dim, output_dim, bias=False)

    return dict(initial_nn=resfnn_params(input_dim),
                initial_nn1=resfnn_params(input_dim),
                lstm=lstm, w_out=w_out)


def generator_forward(params, batch_size, n_lags, key, *, input_dim, hidden_dim,
                      n_layers, noise_scale=0.3, BM=False):
    kz, kz0 = jax.random.split(key)
    z = noise_scale * jax.random.normal(kz, (batch_size, n_lags, input_dim), jnp.float32)
    if BM:
        z = jnp.cumsum(z, axis=1)
    z0 = noise_scale * jax.random.normal(kz0, (batch_size, input_dim), jnp.float32)

    z_tm = jnp.transpose(z, (1, 0, 2))                         # (T, B, D) time-major
    out_tm = generator_pallas(params, z_tm, z0)                # (T, B, out_dim)
    x = jnp.transpose(out_tm, (1, 0, 2))                       # (B, T, out_dim)
    return x, (z, z0)


# ----------------------------- pure-JAX reference check ------------------------------

def ref_forward(params, z, z0, hidden_dim, n_layers):
    H, L = hidden_dim, n_layers

    def resfnn(p, x):
        w1, b1, w2, b2, w3, b3 = p
        y = _leaky_relu(x @ w1 + b1)
        if x.shape[1] == w1.shape[1]:
            y = x + y
        y = y + _leaky_relu(y @ w2 + b2)
        out = jnp.tanh(jnp.tanh(y) @ w3 + b3)                  # outer Tanh of Sequential
        return jnp.transpose(out.reshape(-1, L, H), (1, 0, 2))  # (L, B, H)

    h = resfnn(params['initial_nn'], z0)
    c = resfnn(params['initial_nn1'], z0)

    def step(carry, x_t):
        h, c = carry
        hs, cs = [], []
        inp = x_t
        for l in range(L):
            w_ih, w_hh, b = params['lstm'][l]
            gates = inp @ w_ih + h[l] @ w_hh + b
            i = jax.nn.sigmoid(gates[:, :H])
            f = jax.nn.sigmoid(gates[:, H:2 * H])
            g = jnp.tanh(gates[:, 2 * H:3 * H])
            o = jax.nn.sigmoid(gates[:, 3 * H:])
            c_new = f * c[l] + i * g
            h_new = o * jnp.tanh(c_new)
            hs.append(h_new)
            cs.append(c_new)
            inp = h_new
        return (jnp.stack(hs), jnp.stack(cs)), inp

    _, h1 = jax.lax.scan(step, (h, c), jnp.transpose(z, (1, 0, 2)))   # (T, B, H)
    return jnp.transpose(jnp.tanh(h1) @ params['w_out'], (1, 0, 2))


if __name__ == "__main__":
    input_dim, output_dim, hidden_dim, n_layers = 4, 3, 32, 2
    batch_size, n_lags = 2, 8

    key = jax.random.PRNGKey(0)
    kp, kf = jax.random.split(key)
    params = init_generator_params(kp, input_dim, output_dim, hidden_dim, n_layers)

    x, (z, z0) = generator_forward(params, batch_size, n_lags, kf,
                                   input_dim=input_dim, hidden_dim=hidden_dim,
                                   n_layers=n_layers)
    x = jax.block_until_ready(x)
    assert x.shape == (batch_size, n_lags, output_dim)

    ref = ref_forward(params, z, z0, hidden_dim, n_layers)
    max_err = float(jnp.max(jnp.abs(x - ref)))
    assert jnp.allclose(x, ref, atol=1e-3), f"max abs err {max_err}"

    print("KERNEL_OK")
</pallas_src>

<mosaic_0001>
module attributes {stable_mosaic.version = 11 : i64} {
  func.func @kernel(%arg0: memref<64x4xf32, #tpu.memory_space<vmem>>, %arg1: memref<8x4xf32, #tpu.memory_space<vmem>>, %arg2: memref<4x64xf32, #tpu.memory_space<vmem>>, %arg3: memref<1x64xf32, #tpu.memory_space<vmem>>, %arg4: memref<64x64xf32, #tpu.memory_space<vmem>>, %arg5: memref<1x64xf32, #tpu.memory_space<vmem>>, %arg6: memref<64x128xf32, #tpu.memory_space<vmem>>, %arg7: memref<1x128xf32, #tpu.memory_space<vmem>>, %arg8: memref<4x128xf32, #tpu.memory_space<vmem>>, %arg9: memref<32x128xf32, #tpu.memory_space<vmem>>, %arg10: memref<1x128xf32, #tpu.memory_space<vmem>>, %arg11: memref<64x128xf32, #tpu.memory_space<vmem>>, %arg12: memref<1x128xf32, #tpu.memory_space<vmem>>, %arg13: memref<32x128xf32, #tpu.memory_space<vmem>>, %arg14: memref<64x128xf32, #tpu.memory_space<vmem>>, %arg15: memref<64x128xf32, #tpu.memory_space<vmem>>, %arg16: memref<64x32xf32, #tpu.memory_space<vmem>>) attributes {dimension_semantics = [], scalar_prefetch = 0 : i64, scratch_operands = 2 : i64, tpu.core_type = #tpu.core_type<tc>} {
    %c0 = arith.constant 0 : index
    %c0_0 = arith.constant 0 : index
    %0 = vector.load %arg1[%c0, %c0_0] : memref<8x4xf32, #tpu.memory_space<vmem>>, vector<8x4xf32>
    %c0_1 = arith.constant 0 : index
    %c0_2 = arith.constant 0 : index
    %1 = vector.load %arg2[%c0_1, %c0_2] : memref<4x64xf32, #tpu.memory_space<vmem>>, vector<4x64xf32>
    %cst = arith.constant dense<0.000000e+00> : vector<8x64xf32>
    %2 = tpu.matmul %0, %1, %cst {dimension_numbers = #tpu.dot_dimension_numbers<[1], [0], [0], [1], [0, 0, 1, 1], [], []>} : vector<8x4xf32>, vector<4x64xf32>, vector<8x64xf32> -> vector<8x64xf32>
    %c0_3 = arith.constant 0 : index
    %c0_4 = arith.constant 0 : index
    %3 = vector.load %arg3[%c0_3, %c0_4] : memref<1x64xf32, #tpu.memory_space<vmem>>, vector<1x64xf32>
    %4 = vector.broadcast %3 : vector<1x64xf32> to vector<8x64xf32>
    %5 = arith.addf %2, %4 : vector<8x64xf32>
    %cst_5 = arith.constant 0.000000e+00 : f32
    %6 = vector.broadcast %cst_5 : f32 to vector<8x64xf32>
    %7 = arith.cmpf oge, %5, %6 : vector<8x64xf32>
    %cst_6 = arith.constant 0.00999999977 : f32
    %8 = vector.broadcast %cst_6 : f32 to vector<8x64xf32>
    %9 = arith.mulf %8, %5 : vector<8x64xf32>
    %10 = arith.select %7, %5, %9 : vector<8x64xi1>, vector<8x64xf32>
    %c0_7 = arith.constant 0 : index
    %c0_8 = arith.constant 0 : index
    %11 = vector.load %arg4[%c0_7, %c0_8] : memref<64x64xf32, #tpu.memory_space<vmem>>, vector<64x64xf32>
    %cst_9 = arith.constant dense<0.000000e+00> : vector<8x64xf32>
    %12 = tpu.matmul %10, %11, %cst_9 {dimension_numbers = #tpu.dot_dimension_numbers<[1], [0], [0], [1], [0, 0, 1, 1], [], []>} : vector<8x64xf32>, vector<64x64xf32>, vector<8x64xf32> -> vector<8x64xf32>
    %c0_10 = arith.constant 0 : index
    %c0_11 = arith.constant 0 : index
    %13 = vector.load %arg5[%c0_10, %c0_11] : memref<1x64xf32, #tpu.memory_space<vmem>>, vector<1x64xf32>
    %14 = vector.broadcast %13 : vector<1x64xf32> to vector<8x64xf32>
    %15 = arith.addf %12, %14 : vector<8x64xf32>
    %cst_12 = arith.constant 0.000000e+00 : f32
    %16 = vector.broadcast %cst_12 : f32 to vector<8x64xf32>
    %17 = arith.cmpf oge, %15, %16 : vector<8x64xf32>
    %cst_13 = arith.constant 0.00999999977 : f32
    %18 = vector.broadcast %cst_13 : f32 to vector<8x64xf32>
    %19 = arith.mulf %18, %15 : vector<8x64xf32>
    %20 = arith.select %17, %15, %19 : vector<8x64xi1>, vector<8x64xf32>
    %21 = arith.addf %10, %20 : vector<8x64xf32>
    %22 = math.tanh %21 : vector<8x64xf32>
    %c0_14 = arith.constant 0 : index
    %c0_15 = arith.constant 0 : index
    %23 = vector.load %arg6[%c0_14, %c0_15] : memref<64x128xf32, #tpu.memory_space<vmem>>, vector<64x128xf32>
    %cst_16 = arith.constant dense<0.000000e+00> : vector<8x128xf32>
    %24 = tpu.matmul %22, %23, %cst_16 {dimension_numbers = #tpu.dot_dimension_numbers<[1], [0], [0], [1], [0, 0, 1, 1], [], []>} : vector<8x64xf32>, vector<64x128xf32>, vector<8x128xf32> -> vector<8x128xf32>
    %c0_17 = arith.constant 0 : index
    %c0_18 = arith.constant 0 : index
    %25 = vector.load %arg7[%c0_17, %c0_18] : memref<1x128xf32, #tpu.memory_space<vmem>>, vector<1x128xf32>
    %26 = vector.broadcast %25 : vector<1x128xf32> to vector<8x128xf32>
    %27 = arith.addf %24, %26 : vector<8x128xf32>
    %28 = math.tanh %27 : vector<8x128xf32>
    %29 = vector.extract_strided_slice %28 {offsets = [0, 0], sizes = [8, 32], strides = [1, 1]} : vector<8x128xf32> to vector<8x32xf32>
    %30 = vector.extract_strided_slice %28 {offsets = [0, 32], sizes = [8, 32], strides = [1, 1]} : vector<8x128xf32> to vector<8x32xf32>
    %31 = vector.extract_strided_slice %28 {offsets = [0, 64], sizes = [8, 32], strides = [1, 1]} : vector<8x128xf32> to vector<8x32xf32>
    %32 = vector.extract_strided_slice %28 {offsets = [0, 96], sizes = [8, 32], strides = [1, 1]} : vector<8x128xf32> to vector<8x32xf32>
    %c0_19 = arith.constant 0 : index
    %c0_20 = arith.constant 0 : index
    %33 = vector.load %arg0[%c0_19, %c0_20] : memref<64x4xf32, #tpu.memory_space<vmem>>, vector<64x4xf32>
    %c0_21 = arith.constant 0 : index
    %c0_22 = arith.constant 0 : index
    %34 = vector.load %arg8[%c0_21, %c0_22] : memref<4x128xf32, #tpu.memory_space<vmem>>, vector<4x128xf32>
    %cst_23 = arith.constant dense<0.000000e+00> : vector<64x128xf32>
    %35 = tpu.matmul %33, %34, %cst_23 {dimension_numbers = #tpu.dot_dimension_numbers<[1], [0], [0], [1], [0, 0, 1, 1], [], []>} : vector<64x4xf32>, vector<4x128xf32>, vector<64x128xf32> -> vector<64x128xf32>
    %c0_24 = arith.constant 0 : index
    %c0_25 = arith.constant 0 : index
    %36 = vector.load %arg10[%c0_24, %c0_25] : memref<1x128xf32, #tpu.memory_space<vmem>>, vector<1x128xf32>
    %37 = vector.broadcast %36 : vector<1x128xf32> to vector<64x128xf32>
    %38 = arith.addf %35, %37 : vector<64x128xf32>
    %c0_26 = arith.constant 0 : index
    %c0_27 = arith.constant 0 : index
    %39 = vector.load %arg15[%c0_26, %c0_27] : memref<64x128xf32, #tpu.memory_space<vmem>>, vector<64x128xf32>
    tpu.vector_store %arg15[%c0_26, %c0_27], %38 {strides = array<i32>} : memref<64x128xf32, #tpu.memory_space<vmem>>, vector<64x128xf32>,
    %c0_28 = arith.constant 0 : index
    %c0_29 = arith.constant 0 : index
    %40 = vector.load %arg9[%c0_28, %c0_29] : memref<32x128xf32, #tpu.memory_space<vmem>>, vector<32x128xf32>
    %c0_30 = arith.constant 0 : index
    %c0_31 = arith.constant 0 : index
    %41 = vector.load %arg11[%c0_30, %c0_31] : memref<64x128xf32, #tpu.memory_space<vmem>>, vector<64x128xf32>
    %c0_32 = arith.constant 0 : index
    %c0_33 = arith.constant 0 : index
    %42 = vector.load %arg12[%c0_32, %c0_33] : memref<1x128xf32, #tpu.memory_space<vmem>>, vector<1x128xf32>
    %43 = vector.shape_cast %42 : vector<1x128xf32> to vector<1x128xf32>
    %44 = vector.broadcast %43 : vector<1x128xf32> to vector<8x128xf32>
    %c0_34 = arith.constant 0 : index
    %c0_35 = arith.constant 0 : index
    %45 = vector.load %arg13[%c0_34, %c0_35] : memref<32x128xf32, #tpu.memory_space<vmem>>, vector<32x128xf32>
    %c0_36 = arith.constant 0 : index
    %c0_37 = arith.constant 0 : index
    %46 = vector.load %arg15[%c0_36, %c0_37] : memref<64x128xf32, #tpu.memory_space<vmem>>, vector<8x128xf32>
    %cst_38 = arith.constant dense<0.000000e+00> : vector<8x128xf32>
    %47 = tpu.matmul %29, %40, %cst_38 {dimension_numbers = #tpu.dot_dimension_numbers<[1], [0], [0], [1], [0, 0, 1, 1], [], []>} : vector<8x32xf32>, vector<32x128xf32>, vector<8x128xf32> -> vector<8x128xf32>
    %48 = arith.addf %46, %47 : vector<8x128xf32>
    %49 = arith.negf %48 : vector<8x128xf32>
    %50 = math.exp %49 : vector<8x128xf32>
    %cst_39 = arith.constant 1.000000e+00 : f32
    %51 = vector.broadcast %cst_39 : f32 to vector<8x128xf32>
    %52 = arith.addf %51, %50 : vector<8x128xf32>
    %53 = arith.divf %51, %52 : vector<8x128xf32>
    %54 = math.tanh %48 : vector<8x128xf32>
    %55 = vector.extract_strided_slice %53 {offsets = [0, 0], sizes = [8, 32], strides = [1, 1]} : vector<8x128xf32> to vector<8x32xf32>
    %56 = vector.extract_strided_slice %53 {offsets = [0, 32], sizes = [8, 32], strides = [1, 1]} : vector<8x128xf32> to vector<8x32xf32>
    %57 = vector.extract_strided_slice %54 {offsets = [0, 64], sizes = [8, 32], strides = [1, 1]} : vector<8x128xf32> to vector<8x32xf32>
    %58 = vector.extract_strided_slice %53 {offsets = [0, 96], sizes = [8, 32], strides = [1, 1]} : vector<8x128xf32> to vector<8x32xf32>
    %59 = arith.mulf %56, %31 : vector<8x32xf32>
    %60 = arith.mulf %55, %57 : vector<8x32xf32>
    %61 = arith.addf %59, %60 : vector<8x32xf32>
    %62 = math.tanh %61 : vector<8x32xf32>
    %63 = arith.mulf %58, %62 : vector<8x32xf32>
    %64 = tpu.concatenate %63, %30 in 1 : vector<8x32xf32>, vector<8x32xf32> -> vector<8x64xf32>
    %cst_40 = arith.constant dense<0.000000e+00> : vector<8x128xf32>
    %65 = tpu.matmul %64, %41, %cst_40 {dimension_numbers = #tpu.dot_dimension_numbers<[1], [0], [0], [1], [0, 0, 1, 1], [], []>} : vector<8x64xf32>, vector<64x128xf32>, vector<8x128xf32> -> vector<8x128xf32>
    %66 = arith.addf %65, %44 : vector<8x128xf32>
    %67 = arith.negf %66 : vector<8x128xf32>
    %68 = math.exp %67 : vector<8x128xf32>
    %cst_41 = arith.constant 1.000000e+00 : f32
    %69 = vector.broadcast %cst_41 : f32 to vector<8x128xf32>
    %70 = arith.addf %69, %68 : vector<8x128xf32>
    %71 = arith.divf %69, %70 : vector<8x128xf32>
    %72 = math.tanh %66 : vector<8x128xf32>
    %73 = vector.extract_strided_slice %71 {offsets = [0, 0], sizes = [8, 32], strides = [1, 1]} : vector<8x128xf32> to vector<8x32xf32>
    %74 = vector.extract_strided_slice %71 {offsets = [0, 32], sizes = [8, 32], strides = [1, 1]} : vector<8x128xf32> to vector<8x32xf32>
    %75 = vector.extract_strided_slice %72 {offsets = [0, 64], sizes = [8, 32], strides = [1, 1]} : vector<8x128xf32> to vector<8x32xf32>
    %76 = vector.extract_strided_slice %71 {offsets = [0, 96], sizes = [8, 32], strides = [1, 1]} : vector<8x128xf32> to vector<8x32xf32>
    %77 = arith.mulf %74, %32 : vector<8x32xf32>
    %78 = arith.mulf %73, %75 : vector<8x32xf32>
    %79 = arith.addf %77, %78 : vector<8x32xf32>
    %80 = math.tanh %79 : vector<8x32xf32>
    %81 = arith.mulf %76, %80 : vector<8x32xf32>
    %82 = math.tanh %81 : vector<8x32xf32>
    %c0_42 = arith.constant 0 : index
    %c0_43 = arith.constant 0 : index
    %83 = vector.load %arg16[%c0_42, %c0_43] : memref<64x32xf32, #tpu.memory_space<vmem>>, vector<8x32xf32>
    tpu.vector_store %arg16[%c0_42, %c0_43], %82 {strides = array<i32>} : memref<64x32xf32, #tpu.memory_space<vmem>>, vector<8x32xf32>,
    %c8 = arith.constant 8 : index
    %c0_44 = arith.constant 0 : index
    %84 = vector.load %arg15[%c8, %c0_44] : memref<64x128xf32, #tpu.memory_space<vmem>>, vector<8x128xf32>
    %cst_45 = arith.constant dense<0.000000e+00> : vector<8x128xf32>
    %85 = tpu.matmul %63, %40, %cst_45 {dimension_numbers = #tpu.dot_dimension_numbers<[1], [0], [0], [1], [0, 0, 1, 1], [], []>} : vector<8x32xf32>, vector<32x128xf32>, vector<8x128xf32> -> vector<8x128xf32>
    %86 = arith.addf %84, %85 : vector<8x128xf32>
    %87 = arith.negf %86 : vector<8x128xf32>
    %88 = math.exp %87 : vector<8x128xf32>
    %cst_46 = arith.constant 1.000000e+00 : f32
    %89 = vector.broadcast %cst_46 : f32 to vector<8x128xf32>
    %90 = arith.addf %89, %88 : vector<8x128xf32>
    %91 = arith.divf %89, %90 : vector<8x128xf32>
    %92 = math.tanh %86 : vector<8x128xf32>
    %93 = vector.extract_strided_slice %91 {offsets = [0, 0], sizes = [8, 32], strides = [1, 1]} : vector<8x128xf32> to vector<8x32xf32>
    %94 = vector.extract_strided_slice %91 {offsets = [0, 32], sizes = [8, 32], strides = [1, 1]} : vector<8x128xf32> to vector<8x32xf32>
    %95 = vector.extract_strided_slice %92 {offsets = [0, 64], sizes = [8, 32], strides = [1, 1]} : vector<8x128xf32> to vector<8x32xf32>
    %96 = vector.extract_strided_slice %91 {offsets = [0, 96], sizes = [8, 32], strides = [1, 1]} : vector<8x128xf32> to vector<8x32xf32>
    %97 = arith.mulf %94, %61 : vector<8x32xf32>
    %98 = arith.mulf %93, %95 : vector<8x32xf32>
    %99 = arith.addf %97, %98 : vector<8x32xf32>
    %100 = math.tanh %99 : vector<8x32xf32>
    %101 = arith.mulf %96, %100 : vector<8x32xf32>
    %102 = tpu.concatenate %101, %81 in 1 : vector<8x32xf32>, vector<8x32xf32> -> vector<8x64xf32>
    %cst_47 = arith.constant dense<0.000000e+00> : vector<8x128xf32>
    %103 = tpu.matmul %102, %41, %cst_47 {dimension_numbers = #tpu.dot_dimension_numbers<[1], [0], [0], [1], [0, 0, 1, 1], [], []>} : vector<8x64xf32>, vector<64x128xf32>, vector<8x128xf32> -> vector<8x128xf32>
    %104 = arith.addf %103, %44 : vector<8x128xf32>
    %105 = arith.negf %104 : vector<8x128xf32>
    %106 = math.exp %105 : vector<8x128xf32>
    %cst_48 = arith.constant 1.000000e+00 : f32
    %107 = vector.broadcast %cst_48 : f32 to vector<8x128xf32>
    %108 = arith.addf %107, %106 : vector<8x128xf32>
    %109 = arith.divf %107, %108 : vector<8x128xf32>
    %110 = math.tanh %104 : vector<8x128xf32>
    %111 = vector.extract_strided_slice %109 {offsets = [0, 0], sizes = [8, 32], strides = [1, 1]} : vector<8x128xf32> to vector<8x32xf32>
    %112 = vector.extract_strided_slice %109 {offsets = [0, 32], sizes = [8, 32], strides = [1, 1]} : vector<8x128xf32> to vector<8x32xf32>
    %113 = vector.extract_strided_slice %110 {offsets = [0, 64], sizes = [8, 32], strides = [1, 1]} : vector<8x128xf32> to vector<8x32xf32>
    %114 = vector.extract_strided_slice %109 {offsets = [0, 96], sizes = [8, 32], strides = [1, 1]} : vector<8x128xf32> to vector<8x32xf32>
    %115 = arith.mulf %112, %79 : vector<8x32xf32>
    %116 = arith.mulf %111, %113 : vector<8x32xf32>
    %117 = arith.addf %115, %116 : vector<8x32xf32>
    %118 = math.tanh %117 : vector<8x32xf32>
    %119 = arith.mulf %114, %118 : vector<8x32xf32>
    %120 = math.tanh %119 : vector<8x32xf32>
    %c8_49 = arith.constant 8 : index
    %c0_50 = arith.constant 0 : index
    %121 = vector.load %arg16[%c8_49, %c0_50] : memref<64x32xf32, #tpu.memory_space<vmem>>, vector<8x32xf32>
    tpu.vector_store %arg16[%c8_49, %c0_50], %120 {strides = array<i32>} : memref<64x32xf32, #tpu.memory_space<vmem>>, vector<8x32xf32>,
    %c16 = arith.constant 16 : index
    %c0_51 = arith.constant 0 : index
    %122 = vector.load %arg15[%c16, %c0_51] : memref<64x128xf32, #tpu.memory_space<vmem>>, vector<8x128xf32>
    %cst_52 = arith.constant dense<0.000000e+00> : vector<8x128xf32>
    %123 = tpu.matmul %101, %40, %cst_52 {dimension_numbers = #tpu.dot_dimension_numbers<[1], [0], [0], [1], [0, 0, 1, 1], [], []>} : vector<8x32xf32>, vector<32x128xf32>, vector<8x128xf32> -> vector<8x128xf32>
    %124 = arith.addf %122, %123 : vector<8x128xf32>
    %125 = arith.negf %124 : vector<8x128xf32>
    %126 = math.exp %125 : vector<8x128xf32>
    %cst_53 = arith.constant 1.000000e+00 : f32
    %127 = vector.broadcast %cst_53 : f32 to vector<8x128xf32>
    %128 = arith.addf %127, %126 : vector<8x128xf32>
    %129 = arith.divf %127, %128 : vector<8x128xf32>
    %130 = math.tanh %124 : vector<8x128xf32>
    %131 = vector.extract_strided_slice %129 {offsets = [0, 0], sizes = [8, 32], strides = [1, 1]} : vector<8x128xf32> to vector<8x32xf32>
    %132 = vector.extract_strided_slice %129 {offsets = [0, 32], sizes = [8, 32], strides = [1, 1]} : vector<8x128xf32> to vector<8x32xf32>
    %133 = vector.extract_strided_slice %130 {offsets = [0, 64], sizes = [8, 32], strides = [1, 1]} : vector<8x128xf32> to vector<8x32xf32>
    %134 = vector.extract_strided_slice %129 {offsets = [0, 96], sizes = [8, 32], strides = [1, 1]} : vector<8x128xf32> to vector<8x32xf32>
    %135 = arith.mulf %132, %99 : vector<8x32xf32>
    %136 = arith.mulf %131, %133 : vector<8x32xf32>
    %137 = arith.addf %135, %136 : vector<8x32xf32>
    %138 = math.tanh %137 : vector<8x32xf32>
    %139 = arith.mulf %134, %138 : vector<8x32xf32>
    %140 = tpu.concatenate %139, %119 in 1 : vector<8x32xf32>, vector<8x32xf32> -> vector<8x64xf32>
    %cst_54 = arith.constant dense<0.000000e+00> : vector<8x128xf32>
    %141 = tpu.matmul %140, %41, %cst_54 {dimension_numbers = #tpu.dot_dimension_numbers<[1], [0], [0], [1], [0, 0, 1, 1], [], []>} : vector<8x64xf32>, vector<64x128xf32>, vector<8x128xf32> -> vector<8x128xf32>
    %142 = arith.addf %141, %44 : vector<8x128xf32>
    %143 = arith.negf %142 : vector<8x128xf32>
    %144 = math.exp %143 : vector<8x128xf32>
    %cst_55 = arith.constant 1.000000e+00 : f32
    %145 = vector.broadcast %cst_55 : f32 to vector<8x128xf32>
    %146 = arith.addf %145, %144 : vector<8x128xf32>
    %147 = arith.divf %145, %146 : vector<8x128xf32>
    %148 = math.tanh %142 : vector<8x128xf32>
    %149 = vector.extract_strided_slice %147 {offsets = [0, 0], sizes = [8, 32], strides = [1, 1]} : vector<8x128xf32> to vector<8x32xf32>
    %150 = vector.extract_strided_slice %147 {offsets = [0, 32], sizes = [8, 32], strides = [1, 1]} : vector<8x128xf32> to vector<8x32xf32>
    %151 = vector.extract_strided_slice %148 {offsets = [0, 64], sizes = [8, 32], strides = [1, 1]} : vector<8x128xf32> to vector<8x32xf32>
    %152 = vector.extract_strided_slice %147 {offsets = [0, 96], sizes = [8, 32], strides = [1, 1]} : vector<8x128xf32> to vector<8x32xf32>
    %153 = arith.mulf %150, %117 : vector<8x32xf32>
    %154 = arith.mulf %149, %151 : vector<8x32xf32>
    %155 = arith.addf %153, %154 : vector<8x32xf32>
    %156 = math.tanh %155 : vector<8x32xf32>
    %157 = arith.mulf %152, %156 : vector<8x32xf32>
    %158 = math.tanh %157 : vector<8x32xf32>
    %c16_56 = arith.constant 16 : index
    %c0_57 = arith.constant 0 : index
    %159 = vector.load %arg16[%c16_56, %c0_57] : memref<64x32xf32, #tpu.memory_space<vmem>>, vector<8x32xf32>
    tpu.vector_store %arg16[%c16_56, %c0_57], %158 {strides = array<i32>} : memref<64x32xf32, #tpu.memory_space<vmem>>, vector<8x32xf32>,
    %c24 = arith.constant 24 : index
    %c0_58 = arith.constant 0 : index
    %160 = vector.load %arg15[%c24, %c0_58] : memref<64x128xf32, #tpu.memory_space<vmem>>, vector<8x128xf32>
    %cst_59 = arith.constant dense<0.000000e+00> : vector<8x128xf32>
    %161 = tpu.matmul %139, %40, %cst_59 {dimension_numbers = #tpu.dot_dimension_numbers<[1], [0], [0], [1], [0, 0, 1, 1], [], []>} : vector<8x32xf32>, vector<32x128xf32>, vector<8x128xf32> -> vector<8x128xf32>
    %162 = arith.addf %160, %161 : vector<8x128xf32>
    %163 = arith.negf %162 : vector<8x128xf32>
    %164 = math.exp %163 : vector<8x128xf32>
    %cst_60 = arith.constant 1.000000e+00 : f32
    %165 = vector.broadcast %cst_60 : f32 to vector<8x128xf32>
    %166 = arith.addf %165, %164 : vector<8x128xf32>
    %167 = arith.divf %165, %166 : vector<8x128xf32>
    %168 = math.tanh %162 : vector<8x128xf32>
    %169 = vector.extract_strided_slice %167 {offsets = [0, 0], sizes = [8, 32], strides = [1, 1]} : vector<8x128xf32> to vector<8x32xf32>
    %170 = vector.extract_strided_slice %167 {offsets = [0, 32], sizes = [8, 32], strides = [1, 1]} : vector<8x128xf32> to vector<8x32xf32>
    %171 = vector.extract_strided_slice %168 {offsets = [0, 64], sizes = [8, 32], strides = [1, 1]} : vector<8x128xf32> to vector<8x32xf32>
    %172 = vector.extract_strided_slice %167 {offsets = [0, 96], sizes = [8, 32], strides = [1, 1]} : vector<8x128xf32> to vector<8x32xf32>
    %173 = arith.mulf %170, %137 : vector<8x32xf32>
    %174 = arith.mulf %169, %171 : vector<8x32xf32>
    %175 = arith.addf %173, %174 : vector<8x32xf32>
    %176 = math.tanh %175 : vector<8x32xf32>
    %177 = arith.mulf %172, %176 : vector<8x32xf32>
    %178 = tpu.concatenate %177, %157 in 1 : vector<8x32xf32>, vector<8x32xf32> -> vector<8x64xf32>
    %cst_61 = arith.constant dense<0.000000e+00> : vector<8x128xf32>
    %179 = tpu.matmul %178, %41, %cst_61 {dimension_numbers = #tpu.dot_dimension_numbers<[1], [0], [0], [1], [0, 0, 1, 1], [], []>} : vector<8x64xf32>, vector<64x128xf32>, vector<8x128xf32> -> vector<8x128xf32>
    %180 = arith.addf %179, %44 : vector<8x128xf32>
    %181 = arith.negf %180 : vector<8x128xf32>
    %182 = math.exp %181 : vector<8x128xf32>
    %cst_62 = arith.constant 1.000000e+00 : f32
    %183 = vector.broadcast %cst_62 : f32 to vector<8x128xf32>
    %184 = arith.addf %183, %182 : vector<8x128xf32>
    %185 = arith.divf %183, %184 : vector<8x128xf32>
    %186 = math.tanh %180 : vector<8x128xf32>
    %187 = vector.extract_strided_slice %185 {offsets = [0, 0], sizes = [8, 32], strides = [1, 1]} : vector<8x128xf32> to vector<8x32xf32>
    %188 = vector.extract_strided_slice %185 {offsets = [0, 32], sizes = [8, 32], strides = [1, 1]} : vector<8x128xf32> to vector<8x32xf32>
    %189 = vector.extract_strided_slice %186 {offsets = [0, 64], sizes = [8, 32], strides = [1, 1]} : vector<8x128xf32> to vector<8x32xf32>
    %190 = vector.extract_strided_slice %185 {offsets = [0, 96], sizes = [8, 32], strides = [1, 1]} : vector<8x128xf32> to vector<8x32xf32>
    %191 = arith.mulf %188, %155 : vector<8x32xf32>
    %192 = arith.mulf %187, %189 : vector<8x32xf32>
    %193 = arith.addf %191, %192 : vector<8x32xf32>
    %194 = math.tanh %193 : vector<8x32xf32>
    %195 = arith.mulf %190, %194 : vector<8x32xf32>
    %196 = math.tanh %195 : vector<8x32xf32>
    %c24_63 = arith.constant 24 : index
    %c0_64 = arith.constant 0 : index
    %197 = vector.load %arg16[%c24_63, %c0_64] : memref<64x32xf32, #tpu.memory_space<vmem>>, vector<8x32xf32>
    tpu.vector_store %arg16[%c24_63, %c0_64], %196 {strides = array<i32>} : memref<64x32xf32, #tpu.memory_space<vmem>>, vector<8x32xf32>,
    %c32 = arith.constant 32 : index
    %c0_65 = arith.constant 0 : index
    %198 = vector.load %arg15[%c32, %c0_65] : memref<64x128xf32, #tpu.memory_space<vmem>>, vector<8x128xf32>
    %cst_66 = arith.constant dense<0.000000e+00> : vector<8x128xf32>
    %199 = tpu.matmul %177, %40, %cst_66 {dimension_numbers = #tpu.dot_dimension_numbers<[1], [0], [0], [1], [0, 0, 1, 1], [], []>} : vector<8x32xf32>, vector<32x128xf32>, vector<8x128xf32> -> vector<8x128xf32>
    %200 = arith.addf %198, %199 : vector<8x128xf32>
    %201 = arith.negf %200 : vector<8x128xf32>
    %202 = math.exp %201 : vector<8x128xf32>
    %cst_67 = arith.constant 1.000000e+00 : f32
    %203 = vector.broadcast %cst_67 : f32 to vector<8x128xf32>
    %204 = arith.addf %203, %202 : vector<8x128xf32>
    %205 = arith.divf %203, %204 : vector<8x128xf32>
    %206 = math.tanh %200 : vector<8x128xf32>
    %207 = vector.extract_strided_slice %205 {offsets = [0, 0], sizes = [8, 32], strides = [1, 1]} : vector<8x128xf32> to vector<8x32xf32>
    %208 = vector.extract_strided_slice %205 {offsets = [0, 32], sizes = [8, 32], strides = [1, 1]} : vector<8x128xf32> to vector<8x32xf32>
    %209 = vector.extract_strided_slice %206 {offsets = [0, 64], sizes = [8, 32], strides = [1, 1]} : vector<8x128xf32> to vector<8x32xf32>
    %210 = vector.extract_strided_slice %205 {offsets = [0, 96], sizes = [8, 32], strides = [1, 1]} : vector<8x128xf32> to vector<8x32xf32>
    %211 = arith.mulf %208, %175 : vector<8x32xf32>
    %212 = arith.mulf %207, %209 : vector<8x32xf32>
    %213 = arith.addf %211, %212 : vector<8x32xf32>
    %214 = math.tanh %213 : vector<8x32xf32>
    %215 = arith.mulf %210, %214 : vector<8x32xf32>
    %216 = tpu.concatenate %215, %195 in 1 : vector<8x32xf32>, vector<8x32xf32> -> vector<8x64xf32>
    %cst_68 = arith.constant dense<0.000000e+00> : vector<8x128xf32>
    %217 = tpu.matmul %216, %41, %cst_68 {dimension_numbers = #tpu.dot_dimension_numbers<[1], [0], [0], [1], [0, 0, 1, 1], [], []>} : vector<8x64xf32>, vector<64x128xf32>, vector<8x128xf32> -> vector<8x128xf32>
    %218 = arith.addf %217, %44 : vector<8x128xf32>
    %219 = arith.negf %218 : vector<8x128xf32>
    %220 = math.exp %219 : vector<8x128xf32>
    %cst_69 = arith.constant 1.000000e+00 : f32
    %221 = vector.broadcast %cst_69 : f32 to vector<8x128xf32>
    %222 = arith.addf %221, %220 : vector<8x128xf32>
    %223 = arith.divf %221, %222 : vector<8x128xf32>
    %224 = math.tanh %218 : vector<8x128xf32>
    %225 = vector.extract_strided_slice %223 {offsets = [0, 0], sizes = [8, 32], strides = [1, 1]} : vector<8x128xf32> to vector<8x32xf32>
    %226 = vector.extract_strided_slice %223 {offsets = [0, 32], sizes = [8, 32], strides = [1, 1]} : vector<8x128xf32> to vector<8x32xf32>
    %227 = vector.extract_strided_slice %224 {offsets = [0, 64], sizes = [8, 32], strides = [1, 1]} : vector<8x128xf32> to vector<8x32xf32>
    %228 = vector.extract_strided_slice %223 {offsets = [0, 96], sizes = [8, 32], strides = [1, 1]} : vector<8x128xf32> to vector<8x32xf32>
    %229 = arith.mulf %226, %193 : vector<8x32xf32>
    %230 = arith.mulf %225, %227 : vector<8x32xf32>
    %231 = arith.addf %229, %230 : vector<8x32xf32>
    %232 = math.tanh %231 : vector<8x32xf32>
    %233 = arith.mulf %228, %232 : vector<8x32xf32>
    %234 = math.tanh %233 : vector<8x32xf32>
    %c32_70 = arith.constant 32 : index
    %c0_71 = arith.constant 0 : index
    %235 = vector.load %arg16[%c32_70, %c0_71] : memref<64x32xf32, #tpu.memory_space<vmem>>, vector<8x32xf32>
    tpu.vector_store %arg16[%c32_70, %c0_71], %234 {strides = array<i32>} : memref<64x32xf32, #tpu.memory_space<vmem>>, vector<8x32xf32>,
    %c40 = arith.constant 40 : index
    %c0_72 = arith.constant 0 : index
    %236 = vector.load %arg15[%c40, %c0_72] : memref<64x128xf32, #tpu.memory_space<vmem>>, vector<8x128xf32>
    %cst_73 = arith.constant dense<0.000000e+00> : vector<8x128xf32>
    %237 = tpu.matmul %215, %40, %cst_73 {dimension_numbers = #tpu.dot_dimension_numbers<[1], [0], [0], [1], [0, 0, 1, 1], [], []>} : vector<8x32xf32>, vector<32x128xf32>, vector<8x128xf32> -> vector<8x128xf32>
    %238 = arith.addf %236, %237 : vector<8x128xf32>
    %239 = arith.negf %238 : vector<8x128xf32>
    %240 = math.exp %239 : vector<8x128xf32>
    %cst_74 = arith.constant 1.000000e+00 : f32
    %241 = vector.broadcast %cst_74 : f32 to vector<8x128xf32>
    %242 = arith.addf %241, %240 : vector<8x128xf32>
    %243 = arith.divf %241, %242 : vector<8x128xf32>
    %244 = math.tanh %238 : vector<8x128xf32>
    %245 = vector.extract_strided_slice %243 {offsets = [0, 0], sizes = [8, 32], strides = [1, 1]} : vector<8x128xf32> to vector<8x32xf32>
    %246 = vector.extract_strided_slice %243 {offsets = [0, 32], sizes = [8, 32], strides = [1, 1]} : vector<8x128xf32> to vector<8x32xf32>
    %247 = vector.extract_strided_slice %244 {offsets = [0, 64], sizes = [8, 32], strides = [1, 1]} : vector<8x128xf32> to vector<8x32xf32>
    %248 = vector.extract_strided_slice %243 {offsets = [0, 96], sizes = [8, 32], strides = [1, 1]} : vector<8x128xf32> to vector<8x32xf32>
    %249 = arith.mulf %246, %213 : vector<8x32xf32>
    %250 = arith.mulf %245, %247 : vector<8x32xf32>
    %251 = arith.addf %249, %250 : vector<8x32xf32>
    %252 = math.tanh %251 : vector<8x32xf32>
    %253 = arith.mulf %248, %252 : vector<8x32xf32>
    %254 = tpu.concatenate %253, %233 in 1 : vector<8x32xf32>, vector<8x32xf32> -> vector<8x64xf32>
    %cst_75 = arith.constant dense<0.000000e+00> : vector<8x128xf32>
    %255 = tpu.matmul %254, %41, %cst_75 {dimension_numbers = #tpu.dot_dimension_numbers<[1], [0], [0], [1], [0, 0, 1, 1], [], []>} : vector<8x64xf32>, vector<64x128xf32>, vector<8x128xf32> -> vector<8x128xf32>
    %256 = arith.addf %255, %44 : vector<8x128xf32>
    %257 = arith.negf %256 : vector<8x128xf32>
    %258 = math.exp %257 : vector<8x128xf32>
    %cst_76 = arith.constant 1.000000e+00 : f32
    %259 = vector.broadcast %cst_76 : f32 to vector<8x128xf32>
    %260 = arith.addf %259, %258 : vector<8x128xf32>
    %261 = arith.divf %259, %260 : vector<8x128xf32>
    %262 = math.tanh %256 : vector<8x128xf32>
    %263 = vector.extract_strided_slice %261 {offsets = [0, 0], sizes = [8, 32], strides = [1, 1]} : vector<8x128xf32> to vector<8x32xf32>
    %264 = vector.extract_strided_slice %261 {offsets = [0, 32], sizes = [8, 32], strides = [1, 1]} : vector<8x128xf32> to vector<8x32xf32>
    %265 = vector.extract_strided_slice %262 {offsets = [0, 64], sizes = [8, 32], strides = [1, 1]} : vector<8x128xf32> to vector<8x32xf32>
    %266 = vector.extract_strided_slice %261 {offsets = [0, 96], sizes = [8, 32], strides = [1, 1]} : vector<8x128xf32> to vector<8x32xf32>
    %267 = arith.mulf %264, %231 : vector<8x32xf32>
    %268 = arith.mulf %263, %265 : vector<8x32xf32>
    %269 = arith.addf %267, %268 : vector<8x32xf32>
    %270 = math.tanh %269 : vector<8x32xf32>
    %271 = arith.mulf %266, %270 : vector<8x32xf32>
    %272 = math.tanh %271 : vector<8x32xf32>
    %c40_77 = arith.constant 40 : index
    %c0_78 = arith.constant 0 : index
    %273 = vector.load %arg16[%c40_77, %c0_78] : memref<64x32xf32, #tpu.memory_space<vmem>>, vector<8x32xf32>
    tpu.vector_store %arg16[%c40_77, %c0_78], %272 {strides = array<i32>} : memref<64x32xf32, #tpu.memory_space<vmem>>, vector<8x32xf32>,
    %c48 = arith.constant 48 : index
    %c0_79 = arith.constant 0 : index
    %274 = vector.load %arg15[%c48, %c0_79] : memref<64x128xf32, #tpu.memory_space<vmem>>, vector<8x128xf32>
    %cst_80 = arith.constant dense<0.000000e+00> : vector<8x128xf32>
    %275 = tpu.matmul %253, %40, %cst_80 {dimension_numbers = #tpu.dot_dimension_numbers<[1], [0], [0], [1], [0, 0, 1, 1], [], []>} : vector<8x32xf32>, vector<32x128xf32>, vector<8x128xf32> -> vector<8x128xf32>
    %276 = arith.addf %274, %275 : vector<8x128xf32>
    %277 = arith.negf %276 : vector<8x128xf32>
    %278 = math.exp %277 : vector<8x128xf32>
    %cst_81 = arith.constant 1.000000e+00 : f32
    %279 = vector.broadcast %cst_81 : f32 to vector<8x128xf32>
    %280 = arith.addf %279, %278 : vector<8x128xf32>
    %281 = arith.divf %279, %280 : vector<8x128xf32>
    %282 = math.tanh %276 : vector<8x128xf32>
    %283 = vector.extract_strided_slice %281 {offsets = [0, 0], sizes = [8, 32], strides = [1, 1]} : vector<8x128xf32> to vector<8x32xf32>
    %284 = vector.extract_strided_slice %281 {offsets = [0, 32], sizes = [8, 32], strides = [1, 1]} : vector<8x128xf32> to vector<8x32xf32>
    %285 = vector.extract_strided_slice %282 {offsets = [0, 64], sizes = [8, 32], strides = [1, 1]} : vector<8x128xf32> to vector<8x32xf32>
    %286 = vector.extract_strided_slice %281 {offsets = [0, 96], sizes = [8, 32], strides = [1, 1]} : vector<8x128xf32> to vector<8x32xf32>
    %287 = arith.mulf %284, %251 : vector<8x32xf32>
    %288 = arith.mulf %283, %285 : vector<8x32xf32>
    %289 = arith.addf %287, %288 : vector<8x32xf32>
    %290 = math.tanh %289 : vector<8x32xf32>
    %291 = arith.mulf %286, %290 : vector<8x32xf32>
    %292 = tpu.concatenate %291, %271 in 1 : vector<8x32xf32>, vector<8x32xf32> -> vector<8x64xf32>
    %cst_82 = arith.constant dense<0.000000e+00> : vector<8x128xf32>
    %293 = tpu.matmul %292, %41, %cst_82 {dimension_numbers = #tpu.dot_dimension_numbers<[1], [0], [0], [1], [0, 0, 1, 1], [], []>} : vector<8x64xf32>, vector<64x128xf32>, vector<8x128xf32> -> vector<8x128xf32>
    %294 = arith.addf %293, %44 : vector<8x128xf32>
    %295 = arith.negf %294 : vector<8x128xf32>
    %296 = math.exp %295 : vector<8x128xf32>
    %cst_83 = arith.constant 1.000000e+00 : f32
    %297 = vector.broadcast %cst_83 : f32 to vector<8x128xf32>
    %298 = arith.addf %297, %296 : vector<8x128xf32>
    %299 = arith.divf %297, %298 : vector<8x128xf32>
    %300 = math.tanh %294 : vector<8x128xf32>
    %301 = vector.extract_strided_slice %299 {offsets = [0, 0], sizes = [8, 32], strides = [1, 1]} : vector<8x128xf32> to vector<8x32xf32>
    %302 = vector.extract_strided_slice %299 {offsets = [0, 32], sizes = [8, 32], strides = [1, 1]} : vector<8x128xf32> to vector<8x32xf32>
    %303 = vector.extract_strided_slice %300 {offsets = [0, 64], sizes = [8, 32], strides = [1, 1]} : vector<8x128xf32> to vector<8x32xf32>
    %304 = vector.extract_strided_slice %299 {offsets = [0, 96], sizes = [8, 32], strides = [1, 1]} : vector<8x128xf32> to vector<8x32xf32>
    %305 = arith.mulf %302, %269 : vector<8x32xf32>
    %306 = arith.mulf %301, %303 : vector<8x32xf32>
    %307 = arith.addf %305, %306 : vector<8x32xf32>
    %308 = math.tanh %307 : vector<8x32xf32>
    %309 = arith.mulf %304, %308 : vector<8x32xf32>
    %310 = math.tanh %309 : vector<8x32xf32>
    %c48_84 = arith.constant 48 : index
    %c0_85 = arith.constant 0 : index
    %311 = vector.load %arg16[%c48_84, %c0_85] : memref<64x32xf32, #tpu.memory_space<vmem>>, vector<8x32xf32>
    tpu.vector_store %arg16[%c48_84, %c0_85], %310 {strides = array<i32>} : memref<64x32xf32, #tpu.memory_space<vmem>>, vector<8x32xf32>,
    %c56 = arith.constant 56 : index
    %c0_86 = arith.constant 0 : index
    %312 = vector.load %arg15[%c56, %c0_86] : memref<64x128xf32, #tpu.memory_space<vmem>>, vector<8x128xf32>
    %cst_87 = arith.constant dense<0.000000e+00> : vector<8x128xf32>
    %313 = tpu.matmul %291, %40, %cst_87 {dimension_numbers = #tpu.dot_dimension_numbers<[1], [0], [0], [1], [0, 0, 1, 1], [], []>} : vector<8x32xf32>, vector<32x128xf32>, vector<8x128xf32> -> vector<8x128xf32>
    %314 = arith.addf %312, %313 : vector<8x128xf32>
    %315 = arith.negf %314 : vector<8x128xf32>
    %316 = math.exp %315 : vector<8x128xf32>
    %cst_88 = arith.constant 1.000000e+00 : f32
    %317 = vector.broadcast %cst_88 : f32 to vector<8x128xf32>
    %318 = arith.addf %317, %316 : vector<8x128xf32>
    %319 = arith.divf %317, %318 : vector<8x128xf32>
    %320 = math.tanh %314 : vector<8x128xf32>
    %321 = vector.extract_strided_slice %319 {offsets = [0, 0], sizes = [8, 32], strides = [1, 1]} : vector<8x128xf32> to vector<8x32xf32>
    %322 = vector.extract_strided_slice %319 {offsets = [0, 32], sizes = [8, 32], strides = [1, 1]} : vector<8x128xf32> to vector<8x32xf32>
    %323 = vector.extract_strided_slice %320 {offsets = [0, 64], sizes = [8, 32], strides = [1, 1]} : vector<8x128xf32> to vector<8x32xf32>
    %324 = vector.extract_strided_slice %319 {offsets = [0, 96], sizes = [8, 32], strides = [1, 1]} : vector<8x128xf32> to vector<8x32xf32>
    %325 = arith.mulf %322, %289 : vector<8x32xf32>
    %326 = arith.mulf %321, %323 : vector<8x32xf32>
    %327 = arith.addf %325, %326 : vector<8x32xf32>
    %328 = math.tanh %327 : vector<8x32xf32>
    %329 = arith.mulf %324, %328 : vector<8x32xf32>
    %330 = tpu.concatenate %329, %309 in 1 : vector<8x32xf32>, vector<8x32xf32> -> vector<8x64xf32>
    %cst_89 = arith.constant dense<0.000000e+00> : vector<8x128xf32>
    %331 = tpu.matmul %330, %41, %cst_89 {dimension_numbers = #tpu.dot_dimension_numbers<[1], [0], [0], [1], [0, 0, 1, 1], [], []>} : vector<8x64xf32>, vector<64x128xf32>, vector<8x128xf32> -> vector<8x128xf32>
    %332 = arith.addf %331, %44 : vector<8x128xf32>
    %333 = arith.negf %332 : vector<8x128xf32>
    %334 = math.exp %333 : vector<8x128xf32>
    %cst_90 = arith.constant 1.000000e+00 : f32
    %335 = vector.broadcast %cst_90 : f32 to vector<8x128xf32>
    %336 = arith.addf %335, %334 : vector<8x128xf32>
    %337 = arith.divf %335, %336 : vector<8x128xf32>
    %338 = math.tanh %332 : vector<8x128xf32>
    %339 = vector.extract_strided_slice %337 {offsets = [0, 0], sizes = [8, 32], strides = [1, 1]} : vector<8x128xf32> to vector<8x32xf32>
    %340 = vector.extract_strided_slice %337 {offsets = [0, 32], sizes = [8, 32], strides = [1, 1]} : vector<8x128xf32> to vector<8x32xf32>
    %341 = vector.extract_strided_slice %338 {offsets = [0, 64], sizes = [8, 32], strides = [1, 1]} : vector<8x128xf32> to vector<8x32xf32>
    %342 = vector.extract_strided_slice %337 {offsets = [0, 96], sizes = [8, 32], strides = [1, 1]} : vector<8x128xf32> to vector<8x32xf32>
    %343 = arith.mulf %340, %307 : vector<8x32xf32>
    %344 = arith.mulf %339, %341 : vector<8x32xf32>
    %345 = arith.addf %343, %344 : vector<8x32xf32>
    %346 = math.tanh %345 : vector<8x32xf32>
    %347 = arith.mulf %342, %346 : vector<8x32xf32>
    %348 = math.tanh %347 : vector<8x32xf32>
    %c56_91 = arith.constant 56 : index
    %c0_92 = arith.constant 0 : index
    %349 = vector.load %arg16[%c56_91, %c0_92] : memref<64x32xf32, #tpu.memory_space<vmem>>, vector<8x32xf32>
    tpu.vector_store %arg16[%c56_91, %c0_92], %348 {strides = array<i32>} : memref<64x32xf32, #tpu.memory_space<vmem>>, vector<8x32xf32>,
    %c0_93 = arith.constant 0 : index
    %c0_94 = arith.constant 0 : index
    %350 = vector.load %arg16[%c0_93, %c0_94] : memref<64x32xf32, #tpu.memory_space<vmem>>, vector<64x32xf32>
    %cst_95 = arith.constant dense<0.000000e+00> : vector<64x128xf32>
    %351 = tpu.matmul %350, %45, %cst_95 {dimension_numbers = #tpu.dot_dimension_numbers<[1], [0], [0], [1], [0, 0, 1, 1], [], []>} : vector<64x32xf32>, vector<32x128xf32>, vector<64x128xf32> -> vector<64x128xf32>
    %c0_96 = arith.constant 0 : index
    %c0_97 = arith.constant 0 : index
    %352 = vector.load %arg14[%c0_96, %c0_97] : memref<64x128xf32, #tpu.memory_space<vmem>>, vector<64x128xf32>
    tpu.vector_store %arg14[%c0_96, %c0_97], %351 {strides = array<i32>} : memref<64x128xf32, #tpu.memory_space<vmem>>, vector<64x128xf32>,
    return
  }
}

</mosaic_0001>

<bundles_post_ra>
// kernel: tpu_custom_call.1
= control target key start
LH: loop header
LB: loop body
LE: loop exit
PB: predicated region body
PF: predicated region fallthrough
CT: control target
= control target key end

     0   :  { %19 = vsyncpa [#allocation5], 0  ;;  %s4070_s0 = inlined_call_operand.vmem [shape: f32[64,4], index: 0, kind: input, shape index: {}]   ;;  %s4071_s1 = inlined_call_operand.vmem [shape: f32[8,4], index: 1, kind: input, shape index: {}]   ;;  %s4072_s2 = inlined_call_operand.hbm [shape: f32[4,64], index: 2, kind: input, shape index: {}]   ;;  %s4073_s3 = inlined_call_operand.hbm [shape: f32[1,64], index: 3, kind: input, shape index: {}]   ;;  %s4074_s4 = inlined_call_operand.vmem [shape: f32[64,64], index: 4, kind: input, shape index: {}]   ;;  %s4075_s5 = inlined_call_operand.hbm [shape: f32[1,64], index: 5, kind: input, shape index: {}]   ;;  %s4076_s6 = inlined_call_operand.hbm [shape: f32[64,128], index: 6, kind: input, shape index: {}]   ;;  %s4077_s7 = inlined_call_operand.hbm [shape: f32[1,128], index: 7, kind: input, shape index: {}]   ;;  %s4078_s8 = inlined_call_operand.hbm [shape: f32[4,128], index: 8, kind: input, shape index: {}]   ;;  %s4079_s9 = inlined_call_operand.vmem [shape: f32[32,128], index: 9, kind: input, shape index: {}]   ;;  %s4080_s10 = inlined_call_operand.vmem [shape: f32[1,128], index: 10, kind: input, shape index: {}]   ;;  %s4081_s11 = inlined_call_operand.hbm [shape: f32[64,128], index: 11, kind: input, shape index: {}]   ;;  %s4082_s12 = inlined_call_operand.vmem [shape: f32[1,128], index: 12, kind: input, shape index: {}]   ;;  %s4083_s13 = inlined_call_operand.hbm [shape: f32[32,128], index: 13, kind: input, shape index: {}]   ;;  %s4084_s14 = inlined_call_operand.hbm [shape: f32[64,128], index: 14, kind: output, shape index: {}]  }
   0x1   :  { %20 = vsyncpa [#allocation8], 0 }
   0x2   :  { %21 = vsyncpa [#allocation11], 0 }
   0x3   :  { %22 = vsyncpa [#allocation14], 0 }
   0x4   :  { %23 = vsyncpa [#allocation17], 0 }
   0x5   :  { %24 = vsyncpa [#allocation6], 0  ;;  %s3347_s29 = smov [#allocation7]   ;;  %s3348_s15 = smov [#allocation10]  }
   0x6   :  { %s45_s30 = sshll.u32 %s3347_s29, 4  ;;  %s66_s16 = sshll.u32 %s3348_s15, 4  ;;  %s46_s30 = int_to_ptr.vmem [resolvable:$true] %s45_s30  ;;  %s67_s16 = int_to_ptr.vmem [resolvable:$true] %s66_s16 }
   0x7   :  { %s3163_s17 = scalar_lea.vmem %s46_s30, 16  ;;  %s3167_s18 = scalar_lea.vmem %s46_s30, 32 }
   0x8   :  { %p3164_p0 = scmp.ne.s32.totalorder %s46_s30, %s3163_s17  ;;  %p3168_p1 = scmp.lt.s32.totalorder %s46_s30, %s46_s30 }
   0x9   :  { %p3169_p2 = scmp.lt.s32.totalorder %s3167_s18, %s3163_s17 }
   0xb   :  { %p3170_p3 = por %p3169_p2, %p3168_p1 }
   0xd   :  { %p3171_p4 = pnand %p3170_p3, %p3164_p0 }
   0xf   :  { %3174 = shalt.err (!%p3171_p4)
}
  0x10   :  { %48 = dma.hbm_to_vmem [thread:$0]  %s4073_s3, 16, %s46_s30, [#allocation8]  }
  0x11   :  { %s3183_s21 = scalar_lea.vmem %s67_s16, 1024  ;;  %p3188_p6 = scmp.lt.s32.totalorder %s67_s16, %s67_s16 }
  0x12   :  { %p3184_p5 = scmp.ne.s32.totalorder %s67_s16, %s3183_s21  ;;  %p3189_p7 = scmp.lt.s32.totalorder %s3183_s21, %s3183_s21 }
  0x14   :  { %p3190_p8 = por %p3189_p7, %p3188_p6 }
  0x16   :  { %p3191_p9 = pnand %p3190_p8, %p3184_p5 }
  0x18   :  { %3194 = shalt.err (!%p3191_p9)
}
  0x19   :  { %s3349_s22 = smov 128   ;;  %s3350_s23 = smov 8  }
  0x1a   :  { %72 = dma.hbm_to_vmem [thread:$0]  %s4076_s6, 1024, %s67_s16, [#allocation11], %s3349_s22, %s3349_s22, %s3350_s23  }
  0x1b   :  { %s3351_s26 = smov [#allocation13]   ;;  %s3352_s28 = smov [#allocation4]  }
  0x1c   :  { %s89_s27 = sshll.u32 %s3351_s26, 4  ;;  %s35_s3 = sshll.u32 %s3352_s28, 4  ;;  %s90_s27 = int_to_ptr.vmem [resolvable:$true] %s89_s27  ;;  %s36_s3 = int_to_ptr.vmem [resolvable:$true] %s35_s3 }
  0x1d   :  { %s3203_s29 = scalar_lea.vmem %s90_s27, 64  ;;  %p3208_p11 = scmp.lt.s32.totalorder %s90_s27, %s90_s27 }
  0x1e   :  { %p3204_p10 = scmp.ne.s32.totalorder %s90_s27, %s3203_s29  ;;  %p3209_p12 = scmp.lt.s32.totalorder %s3203_s29, %s3203_s29 }
  0x20   :  { %p3210_p13 = por %p3209_p12, %p3208_p11 }
  0x22   :  { %p3211_p0 = pnand %p3210_p13, %p3204_p10 }
  0x24   :  { %3214 = shalt.err (!%p3211_p0)
}
  0x25   :  { %92 = dma.hbm_to_vmem [thread:$0]  %s4078_s8, 64, %s90_s27, [#allocation14]  }
  0x26   :  { %s3223_s17 = scalar_lea.vmem %s36_s3, 64  ;;  %p3228_p2 = scmp.lt.s32.totalorder %s36_s3, %s36_s3 }
  0x27   :  { %p3224_p1 = scmp.ne.s32.totalorder %s36_s3, %s3223_s17  ;;  %p3229_p3 = scmp.lt.s32.totalorder %s3223_s17, %s3223_s17 }
  0x29   :  { %p3230_p4 = por %p3229_p3, %p3228_p2 }
  0x2b   :  { %p3231_p5 = pnand %p3230_p4, %p3224_p1 }
  0x2d   :  { %3234 = shalt.err (!%p3231_p5)
}
  0x2e   :  { %38 = dma.hbm_to_vmem [thread:$0]  %s4072_s2, 64, %s36_s3, [#allocation5]  }
  0x2f   :  { %s3353_s18 = smov [#allocation9]   ;;  %s3354_s20 = smov [#allocation12]  }
  0x30   :  { %s57_s19 = sshll.u32 %s3353_s18, 4  ;;  %s79_s21 = sshll.u32 %s3354_s20, 4  ;;  %s58_s19 = int_to_ptr.vmem [resolvable:$true] %s57_s19  ;;  %s80_s21 = int_to_ptr.vmem [resolvable:$true] %s79_s21 }
  0x31   :  { %s3243_s24 = scalar_lea.vmem %s58_s19, 16  ;;  %s3247_s8 = scalar_lea.vmem %s58_s19, 32 }
  0x32   :  { %p3244_p6 = scmp.ne.s32.totalorder %s58_s19, %s3243_s24  ;;  %p3248_p7 = scmp.lt.s32.totalorder %s58_s19, %s58_s19 }
  0x33   :  { %p3249_p8 = scmp.lt.s32.totalorder %s3247_s8, %s3243_s24 }
  0x35   :  { %p3250_p9 = por %p3249_p8, %p3248_p7 }
  0x37   :  { %p3251_p10 = pnand %p3250_p9, %p3244_p6 }
  0x39   :  { %3254 = shalt.err (!%p3251_p10)
}
  0x3a   :  { %60 = dma.hbm_to_vmem [thread:$0]  %s4075_s5, 16, %s58_s19, [#allocation8]  }
  0x3b   :  { %s3263_s27 = scalar_lea.vmem %s80_s21, 16  ;;  %s3267_s2 = scalar_lea.vmem %s80_s21, 32 }
  0x3c   :  { %p3264_p11 = scmp.ne.s32.totalorder %s80_s21, %s3263_s27  ;;  %p3268_p12 = scmp.lt.s32.totalorder %s80_s21, %s80_s21 }
  0x3d   :  { %p3269_p13 = scmp.lt.s32.totalorder %s3267_s2, %s3263_s27 }
  0x3f   :  { %p3270_p0 = por %p3269_p13, %p3268_p12 }
  0x41   :  { %p3271_p1 = pnand %p3270_p0, %p3264_p11 }
  0x43   :  { %3274 = shalt.err (!%p3271_p1)
}
  0x44   :  { %82 = dma.hbm_to_vmem [thread:$0]  %s4077_s7, 16, %s80_s21, [#allocation11]  }
  0x45   :  { %s3355_s29 = smov [#allocation15]   ;;  %s3356_s15 = smov [#allocation16]  }
  0x46   :  { %s102_s30 = sshll.u32 %s3355_s29, 4  ;;  %s116_s17 = sshll.u32 %s3356_s15, 4  ;;  %s103_s30 = int_to_ptr.vmem [resolvable:$true] %s102_s30  ;;  %s117_s17 = int_to_ptr.vmem [resolvable:$true] %s116_s17 }
  0x47   :  { %s3283_s6 = scalar_lea.vmem %s103_s30, 1024  ;;  %p3288_p3 = scmp.lt.s32.totalorder %s103_s30, %s103_s30 }
  0x48   :  { %p3284_p2 = scmp.ne.s32.totalorder %s103_s30, %s3283_s6  ;;  %p3289_p4 = scmp.lt.s32.totalorder %s3283_s6, %s3283_s6 }
  0x4a   :  { %p3290_p5 = por %p3289_p4, %p3288_p3 }
  0x4c   :  { %p3291_p6 = pnand %p3290_p5, %p3284_p2 }
  0x4e   :  { %3294 = shalt.err (!%p3291_p6)
}
  0x4f   :  { %108 = dma.hbm_to_vmem [thread:$0]  %s4081_s11, 1024, %s103_s30, [#allocation14], %s3349_s22, %s3349_s22, %s3350_s23  }
  0x50   :  { %s3303_s7 = scalar_lea.vmem %s117_s17, 512  ;;  %p3308_p8 = scmp.lt.s32.totalorder %s117_s17, %s117_s17 }
  0x51   :  { %p3304_p7 = scmp.ne.s32.totalorder %s117_s17, %s3303_s7  ;;  %p3309_p9 = scmp.lt.s32.totalorder %s3303_s7, %s3303_s7 }
  0x53   :  { %p3310_p10 = por %p3309_p9, %p3308_p8 }
  0x55   :  { %p3311_p11 = pnand %p3310_p10, %p3304_p7 }
  0x57   :  { %3314 = shalt.err (!%p3311_p11)
}
  0x58   :  { %122 = dma.hbm_to_vmem [thread:$0]  %s4083_s13, 512, %s117_s17, [#allocation17], %s3349_s22, %s3349_s22, %s3350_s23  }
  0x59   :  { %3335 = dma.done.wait [#allocation5], 64  }
  0x5a   :  { %3336 = vsyncadd [#allocation5], 4294967232 }
  0x5b   :  { %3337 = dma.done.wait [#allocation8], 32  }
  0x5c   :  { %3338 = vsyncadd [#allocation8], 4294967264 }
  0x5d   :  { %3339 = dma.done.wait [#allocation11], 1040  }
  0x5e   :  { %3340 = vsyncadd [#allocation11], 4294966256 }
  0x5f   :  { %3341 = dma.done.wait [#allocation14], 1088  }
  0x60   :  { %3342 = vsyncadd [#allocation14], 4294966208 }
  0x61   :  { %3343 = dma.done.wait [#allocation17], 512  }
  0x62   :  { %3344 = vsyncadd [#allocation17], 4294966784  ;;  %v3357_v0 = vmov 0.0   ;;  %vm3358_vm0 = vmmov 0   ;;  %vm160_vm1 = vcmask 1043456   ;;  %vm156_vm2 = vcmask 31744  }
  0x63   :  { %2660 = vmatprep.subr.mxu0 %v3357_v0  ;;  %2662 = vmatprep.mubr.msk.f32.mxu0 %vm3358_vm0, %v3357_v0  ;;  %v148_v1 = vld [vmem:[#allocation4] sm:$0xf]  ;;  %v244_v3 = vld [vmem:[%s4074_s4 + $0x38] sm:$0xff]  ;;  %v243_v4 = vld [vmem:[%s4074_s4 + $0x30] sm:$0xff]  ;;  %vm252_vm4 = vcmask 523264   ;;  %vm600_vm6 = vcmask 261120  }
  0x64   :  { %2665 = vmatprep.subr.mxu1 %v3357_v0  ;;  %2681 = vmatprep.mubr.msk.f32.mxu1 %vm3358_vm0, %v3357_v0  ;;  %v147_v2 = vld [vmem:[%s4071_s1] sm:$0xff]  ;;  %v242_v5 = vld [vmem:[%s4074_s4 + $0x28] sm:$0xff]  ;;  %v240_v7 = vld [vmem:[%s4074_s4 + $0x18] sm:$0xff]  ;;  %s3359_s1 = smov 64   ;;  %s3360_s27 = smov 96  }
  0x65   :  { %2661 = vmatpush3.msk.msra.mxu0 %vm160_vm1, %v148_v1  ;;  %2666 = vmatpush3.msra.mxu1 %v244_v3  ;;  %v241_v6 = vld [vmem:[%s4074_s4 + $0x20] sm:$0xff]  ;;  %v239_v8 = vld [vmem:[%s4074_s4 + $0x10] sm:$0xff]  ;;  %v238_v9 = vld [vmem:[%s4074_s4 + $0x8] sm:$0xff]  ;;  %s3361_s2 = smov 32  }
  0x66   :  { %2663 = vmatmul.mubr.msk.f32.vlgmr.msra.gmra.mxu0 %vm156_vm2, %v147_v2  ;;  %2667 = vmatprep.subr.mxu1 %v3357_v0  ;;  %v237_v10 = vld [vmem:[%s4074_s4] sm:$0xff]  ;;  %v337_v18 = vld [vmem:[#allocation10 + $0x30] sm:$0xff]  ;;  %v336_v19 = vld [vmem:[#allocation10 + $0x28] sm:$0xff] }
  0x67   :  { %2668 = vmatpush3.msra.mxu1 %v243_v4  ;;  %2684 = vmatprep.subr.mxu0 %v3357_v0  ;;  %v2449_v11 = vld [vmem:[#allocation7] ss:$0 sm:$0xff]  ;;  %v335_v20 = vld [vmem:[#allocation10 + $0x20] sm:$0xff]  ;;  %v333_v22 = vld [vmem:[#allocation10 + $0x10] sm:$0xff] }
  0x68   :  { %2669 = vmatprep.subr.mxu1 %v3357_v0  ;;  %2700 = vmatprep.mubr.msk.f32.mxu0 %vm3358_vm0, %v3357_v0  ;;  %v338_v17 = vld [vmem:[#allocation10 + $0x38] sm:$0xff]  ;;  %v332_v23 = vld [vmem:[#allocation10 + $0x8] sm:$0xff]  ;;  %v331_v24 = vld [vmem:[#allocation10] sm:$0xff] }
  0x69   :  { %2670 = vmatpush3.msra.mxu1 %v242_v5  ;;  %2685 = vmatpush3.msra.mxu0 %v338_v17  ;;  %v334_v21 = vld [vmem:[#allocation10 + $0x18] sm:$0xff]  ;;  %v428_v33 = vld [vmem:[#allocation13] sm:$0xf]  ;;  %v3534_v35 = vld [vmem:[%s4079_s9 + $0x18] sm:$0xff] }
  0x6a   :  { %2671 = vmatprep.subr.mxu1 %v3357_v0  ;;  %2686 = vmatprep.subr.mxu0 %v3357_v0  ;;  %v2452_v25 = vld [vmem:[#allocation9] ss:$0 sm:$0xff]  ;;  %v421_v36 = vld [vmem:[%s4070_s0 + $0x8] sm:$0xff]  ;;  %v3544_v37 = vld [vmem:[%s4079_s9 + $0x10] sm:$0xff] }
  0x6b   :  { %2672 = vmatpush3.msra.mxu1 %v241_v6  ;;  %2687 = vmatpush3.msra.mxu0 %v337_v18  ;;  %v420_v34 = vld [vmem:[%s4070_s0] sm:$0xff]  ;;  %v3553_v38 = vld [vmem:[%s4079_s9 + $0x8] sm:$0xff]  ;;  %v422_v1 = vld [vmem:[%s4070_s0 + $0x10] sm:$0xff] }
  0x6c   :  { %2673 = vmatprep.subr.mxu1 %v3357_v0  ;;  %2688 = vmatprep.subr.mxu0 %v3357_v0  ;;  %v3561_v39 = vld [vmem:[%s4079_s9] sm:$0xff]  ;;  %v2454_v40 = vld [vmem:[#allocation12] ss:$0 sm:$0xff]  ;;  %v423_v2 = vld [vmem:[%s4070_s0 + $0x18] sm:$0xff] }
  0x6d   :  { %2674 = vmatpush3.msra.mxu1 %v240_v7  ;;  %2689 = vmatpush3.msra.mxu0 %v336_v19  ;;  %v3586_v46 = vld [vmem:[%s4080_s10] ss:$0 sm:$0xff]  ;;  %v3595_v63 = vld [vmem:[#allocation15 + $0x38] sm:$0xff]  ;;  %v3612_v5 = vld [vmem:[#allocation15 + $0x28] sm:$0xff] }
  0x6e   :  { %2675 = vmatprep.subr.mxu1 %v3357_v0  ;;  %2690 = vmatprep.subr.mxu0 %v3357_v0  ;;  %v3605_v3 = vld [vmem:[#allocation15 + $0x30] sm:$0xff]  ;;  %v425_v6 = vld [vmem:[%s4070_s0 + $0x28] sm:$0xff] }
  0x6f   :  { %2676 = vmatpush3.msra.mxu1 %v239_v8  ;;  %2691 = vmatpush3.msra.mxu0 %v335_v20  ;;  %v424_v4 = vld [vmem:[%s4070_s0 + $0x20] sm:$0xff]  ;;  %v3620_v7 = vld [vmem:[#allocation15 + $0x20] sm:$0xff] }
  0x70   :  { %2677 = vmatprep.subr.mxu1 %v3357_v0  ;;  %2692 = vmatprep.subr.mxu0 %v3357_v0  ;;  %v426_v8 = vld [vmem:[%s4070_s0 + $0x30] sm:$0xff] }
  0x71   :  { %2678 = vmatpush3.msra.mxu1 %v238_v9  ;;  %2693 = vmatpush3.msra.mxu0 %v334_v21  ;;  %v3628_v9 = vld [vmem:[#allocation15 + $0x18] sm:$0xff] }
  0x72   :  { %2679 = vmatprep.subr.mxu1 %v3357_v0  ;;  %2694 = vmatprep.subr.mxu0 %v3357_v0 }
  0x73   :  { %2680 = vmatpush3.msra.mxu1 %v237_v10  ;;  %2695 = vmatpush3.msra.mxu0 %v333_v22  ;;  %v427_v10 = vld [vmem:[%s4070_s0 + $0x38] sm:$0xff] }
  0x74   :  { %2696 = vmatprep.subr.mxu0 %v3357_v0  ;;  %2703 = vmatprep.subr.msk.mxu1 %vm160_vm1, %v428_v33 }
  0x75   :  { %2697 = vmatpush3.msra.mxu0 %v332_v23 }
  0x76   :  { %2698 = vmatprep.subr.mxu0 %v3357_v0 }
  0x77   :  { %2699 = vmatpush3.msra.mxu0 %v331_v24 }
  0x78   :  { %2717 = vmatprep.subr.mxu0 %v3357_v0 }
 0x126   :  { %v230_v12 = vpop.f32.mrf.mxu0 }
 0x127   :  { %v231_v13 = vadd.f32 %v2449_v11, %v230_v12  ;;  %v3636_v11 = vld [vmem:[#allocation15 + $0x10] sm:$0xff] }
 0x128   :  { %v2664_v14 = vpop.f32.mrf.mxu0 }
 0x129   :  { %vm234_vm3 = vcmp.ge.f32.partialorder %v231_v13, 0.0  ;;  %v235_v15 = vmul.f32 0.01, %v231_v13  ;;  %v3646_v14 = vld [vmem:[#allocation15] sm:$0xff] }
 0x12b   :  { %v236_v16 = vsel %vm234_vm3, %v231_v13, %v235_v15  ;;  %v3641_v13 = vld [vmem:[#allocation15 + $0x8] sm:$0xff] }
 0x12c   :  { %2682 = vmatmul.mubr.msk.f32.vlgmr.msra.gmra.mxu1 %vm252_vm4, %v236_v16 }
 0x12d   :  { %2705 = vmatprep.mubr.msk.f32.mxu1 %vm156_vm2, %v420_v34  ;;  %2704 = vmatpush3.msk.msra.mxu1 %vm160_vm1, %v428_v33 }
 0x12e   :  { %2728 = vmatprep.subr.mxu1 %v3357_v0 }
 0x130   :  { %2706 = vmatmul.mubr.msk.f32.vlgmr.msra.gmra.mxu1 %vm156_vm2, %v421_v36 }
 0x131   :  { %2729 = vmatpush3.msra.mxu1 %v3595_v63  ;;  %2708 = vmatprep.mubr.msk.f32.mxu1 %vm156_vm2, %v422_v1 }
 0x132   :  { %2730 = vmatprep.subr.mxu1 %v3357_v0 }
 0x133   :  { %2731 = vmatpush3.msra.mxu1 %v3605_v3 }
 0x134   :  { %2709 = vmatmul.mubr.msk.f32.gmra.mxu1 %vm156_vm2, %v423_v2  ;;  %2732 = vmatprep.subr.mxu1 %v3357_v0 }
 0x135   :  { %2711 = vmatprep.mubr.msk.f32.mxu1 %vm156_vm2, %v424_v4  ;;  %2733 = vmatpush3.msra.mxu1 %v3612_v5 }
 0x136   :  { %2734 = vmatprep.subr.mxu1 %v3357_v0 }
 0x137   :  { %2735 = vmatpush3.msra.mxu1 %v3620_v7 }
 0x138   :  { %2712 = vmatmul.mubr.msk.f32.gmra.mxu1 %vm156_vm2, %v425_v6  ;;  %2736 = vmatprep.subr.mxu1 %v3357_v0 }
 0x139   :  { %2714 = vmatprep.mubr.msk.f32.mxu1 %vm156_vm2, %v426_v8  ;;  %2737 = vmatpush3.msra.mxu1 %v3628_v9 }
 0x13a   :  { %2738 = vmatprep.subr.mxu1 %v3357_v0 }
 0x13b   :  { %2739 = vmatpush3.msra.mxu1 %v3636_v11 }
 0x13c   :  { %2715 = vmatmul.mubr.msk.f32.gmra.mxu1 %vm156_vm2, %v427_v10  ;;  %2740 = vmatprep.subr.mxu1 %v3357_v0 }
 0x13d   :  { %2744 = vmatprep.mubr.msk.f32.mxu1 %vm3358_vm0, %v3357_v0  ;;  %2741 = vmatpush3.msra.mxu1 %v3641_v13 }
 0x13e   :  { %2742 = vmatprep.subr.mxu1 %v3357_v0 }
 0x13f   :  { %2743 = vmatpush3.msra.mxu1 %v3646_v14 }
 0x140   :  { %2777 = vmatprep.subr.mxu1 %v3357_v0 }
 0x1ec   :  { %v322_v26 = vpop.f32.mrf.mxu1 }
 0x1ed   :  { %v323_v27 = vadd.f32 %v2452_v25, %v322_v26  ;;  %v3704_v26 = vld [vmem:[%s4082_s12] ss:$0 sm:$0xff] }
 0x1ee   :  { %v2683_v28 = vpop.f32.mrf.mxu1 }
 0x1ef   :  { %vm326_vm5 = vcmp.ge.f32.partialorder %v323_v27, 0.0  ;;  %v327_v29 = vmul.f32 0.01, %v323_v27 }
 0x1f0   :  { %v3581_v45 = vpop.f32.mrf.mxu1 }
 0x1f1   :  { %v328_v30 = vsel %vm326_vm5, %v323_v27, %v327_v29  ;;  %v535_v24 = vadd.f32 %v3581_v45, %v3586_v46 }
 0x1f2   :  { %v329_v31 = vadd.f32 %v328_v30, %v236_v16  ;;  %v529_v47 = vpop.f32.mrf.mxu1 }
 0x1f3   :  { %v530_v48 = vadd.f32 %v3586_v46, %v529_v47 }
 0x1f4   :  { %2993 = vtanh.f32 %v329_v31  ;;  %v3687_v19 = vpop.f32.mrf.mxu1 }
 0x1f6   :  { %v3689_v20 = vpop.f32.mrf.mxu1 }
 0x1f7   :  { %v540_v10 = vadd.f32 %v3586_v46, %v3689_v20 }
 0x1f8   :  { %v3691_v21 = vpop.f32.mrf.mxu1 }
 0x1fa   :  { %v3693_v22 = vpop.f32.mrf.mxu1 }
 0x1fc   :  { %v3695_v23 = vpop.f32.mrf.mxu1 }
 0x1fe   :  { %v3699_v25 = vpop.f32.mrf.mxu1 }
 0x201   :  { %v2994_v32 = vpop.eup %2993 }
 0x202   :  { %2701 = vmatmul.mubr.msk.f32.vlgmr.msra.gmra.mxu0 %vm252_vm4, %v2994_v32 }
 0x203   :  { %2725 = vmatprep.mubr.msk.f32.mxu0 %vm3358_vm0, %v3357_v0  ;;  %2718 = vmatpush3.msra.mxu0 %v3534_v35 }
 0x204   :  { %2719 = vmatprep.subr.mxu0 %v3357_v0 }
 0x205   :  { %2720 = vmatpush3.msra.mxu0 %v3544_v37 }
 0x206   :  { %2721 = vmatprep.subr.mxu0 %v3357_v0 }
 0x207   :  { %2722 = vmatpush3.msra.mxu0 %v3553_v38 }
 0x208   :  { %2723 = vmatprep.subr.mxu0 %v3357_v0 }
 0x209   :  { %2724 = vmatpush3.msra.mxu0 %v3561_v39 }
 0x20a   :  { %2747 = vmatprep.subr.mxu0 %v3357_v0 }
 0x2c2   :  { %v415_v41 = vpop.f32.mrf.mxu0 }
 0x2c3   :  { %v416_v42 = vadd.f32 %v2454_v40, %v415_v41 }
 0x2c4   :  { %v2702_v43 = vpop.f32.mrf.mxu0 }
 0x2c5   :  { %2995 = vtanh.f32 %v416_v42 }
 0x2d2   :  { %v3567_v44 = vpop.eup %2995 }
 0x2d3   :  { %2726 = vmatmul.mubr.msk.f32.vlgmr.msra.gmra.mxu0 %vm600_vm6, %v3567_v44 }
 0x2d4   :  { %2748 = vmatpush3.msra.mxu0 %v3534_v35  ;;  %2755 = vmatprep.mubr.msk.f32.mxu0 %vm3358_vm0, %v3357_v0 }
 0x2d5   :  { %2749 = vmatprep.subr.mxu0 %v3357_v0 }
 0x2d6   :  { %2750 = vmatpush3.msra.mxu0 %v3544_v37 }
 0x2d7   :  { %2751 = vmatprep.subr.mxu0 %v3357_v0 }
 0x2d8   :  { %2752 = vmatpush3.msra.mxu0 %v3553_v38 }
 0x2d9   :  { %2753 = vmatprep.subr.mxu0 %v3357_v0 }
 0x2da   :  { %2754 = vmatpush3.msra.mxu0 %v3561_v39 }
 0x2db   :  { %2758 = vmatprep.subr.mxu0 %v3357_v0 }
 0x393   :  { %v670_v49 = vpop.f32.mrf.mxu0 }
 0x394   :  { %v674_v50 = vadd.f32 %v670_v49, %v530_v48 }
 0x395   :  { %v2727_v51 = vpop.f32.mrf.mxu0 }
 0x396   :  { %2997 = vtanh.f32 %v674_v50  ;;  %v2468_v53 = vmul.f32 -1.442695, %v674_v50 }
 0x398   :  { %2999 = vpow2.f32 %v2468_v53 }
 0x3a3   :  { %v2998_v52 = vpop.eup %2997 }
 0x3a4   :  { %687 = vrot.lane.b32.xlu0 %v2998_v52, %s3359_s1 }
 0x3a5   :  { %v3000_v54 = vpop.eup %2999 }
 0x3a6   :  { %v678_v55 = vadd.f32 1.0, %v3000_v54 }
 0x3a8   :  { %682 = vrot.lane.b32.xlu0 %v3567_v44, %s3360_s27  ;;  %3001 = vrcp.f32 %v678_v55 }
 0x3b5   :  { %v3002_v56 = vpop.eup %3001 }
 0x416   :  { %v688_v57 = vpop.permute.xlu0 %687 }
 0x417   :  { %v690_v58 = vmul.f32 %v3002_v56, %v688_v57 }
 0x419   :  { %692 = vrot.lane.b32.xlu1 %v690_v58, %s3361_s2 }
 0x41a   :  { %v683_v59 = vpop.permute.xlu0 %682 }
 0x41b   :  { %v685_v60 = vmul.f32 %v3002_v56, %v683_v59 }
 0x48b   :  { %v693_v61 = vpop.permute.xlu1 %692 }
 0x48c   :  { %v3592_v62 = vadd.f32 %v693_v61, %v685_v60 }
 0x48e   :  { %3003 = vtanh.f32 %v3592_v62 }
 0x49b   :  { %v3004_v12 = vpop.eup %3003 }
 0x49c   :  { %698 = vrot.lane.b32.xlu1 %v3004_v12, %s3359_s1 }
 0x50e   :  { %v699_v15 = vpop.permute.xlu1 %698 }
 0x50f   :  { %v701_v16 = vmul.f32 %v3002_v56, %v699_v15 }
 0x511   :  { %703 = vrot.lane.b32.xlu0 %v701_v16, %s3361_s2 }
 0x583   :  { %v704_v17 = vpop.permute.xlu0 %703 }
 0x584   :  { %v706_v18 = vsel %vm600_vm6, %v704_v17, %v3567_v44  ;;  %2756 = vmatmul.mubr.msk.f32.vlgmr.msra.gmra.mxu0 %vm600_vm6, %v704_v17 }
 0x585   :  { %2745 = vmatmul.mubr.msk.f32.vlgmr.msra.gmra.mxu1 %vm252_vm4, %v706_v18  ;;  %2759 = vmatpush3.msra.mxu0 %v3595_v63 }
 0x586   :  { %2760 = vmatprep.subr.mxu0 %v3357_v0  ;;  %2778 = vmatpush3.msra.mxu1 %v3534_v35 }
 0x587   :  { %2761 = vmatpush3.msra.mxu0 %v3605_v3  ;;  %2779 = vmatprep.subr.mxu1 %v3357_v0 }
 0x588   :  { %2762 = vmatprep.subr.mxu0 %v3357_v0  ;;  %2780 = vmatpush3.msra.mxu1 %v3544_v37 }
 0x589   :  { %2763 = vmatpush3.msra.mxu0 %v3612_v5  ;;  %2781 = vmatprep.subr.mxu1 %v3357_v0 }
 0x58a   :  { %2764 = vmatprep.subr.mxu0 %v3357_v0  ;;  %2782 = vmatpush3.msra.mxu1 %v3553_v38 }
 0x58b   :  { %2765 = vmatpush3.msra.mxu0 %v3620_v7  ;;  %2783 = vmatprep.subr.mxu1 %v3357_v0 }
 0x58c   :  { %2766 = vmatprep.subr.mxu0 %v3357_v0  ;;  %2784 = vmatpush3.msra.mxu1 %v3561_v39 }
 0x58d   :  { %2767 = vmatpush3.msra.mxu0 %v3628_v9  ;;  %2785 = vmatprep.mubr.msk.f32.mxu1 %vm3358_vm0, %v3357_v0 }
 0x58e   :  { %2768 = vmatprep.subr.mxu0 %v3357_v0  ;;  %2774 = vmatprep.mubr.msk.f32.mxu0 %vm3358_vm0, %v3357_v0 }
 0x58f   :  { %2769 = vmatpush3.msra.mxu0 %v3636_v11  ;;  %2788 = vmatprep.subr.mxu1 %v3357_v0 }
 0x590   :  { %2770 = vmatprep.subr.mxu0 %v3357_v0 }
 0x591   :  { %2771 = vmatpush3.msra.mxu0 %v3641_v13 }
 0x592   :  { %2772 = vmatprep.subr.mxu0 %v3357_v0 }
 0x593   :  { %2773 = vmatpush3.msra.mxu0 %v3646_v14 }
 0x594   :  { %2807 = vmatprep.subr.mxu0 %v3357_v0 }
 0x644   :  { %v882_v27 = vpop.f32.mrf.mxu0 }
 0x645   :  { %v886_v28 = vadd.f32 %v882_v27, %v535_v24  ;;  %v776_v29 = vpop.f32.mrf.mxu1 }
 0x646   :  { %v777_v30 = vadd.f32 %v3704_v26, %v776_v29  ;;  %v2757_v31 = vpop.f32.mrf.mxu0 }
 0x647   :  { %3005 = vtanh.f32 %v886_v28  ;;  %v2746_v32 = vpop.f32.mrf.mxu1  ;;  %v2472_v36 = vmul.f32 -1.442695, %v886_v28 }
 0x648   :  { %3007 = vtanh.f32 %v777_v30  ;;  %v2470_v40 = vmul.f32 -1.442695, %v777_v30 }
 0x649   :  { %3009 = vpow2.f32 %v2472_v36 }
 0x64a   :  { %3011 = vpow2.f32 %v2470_v40 }
 0x654   :  { %v3006_v33 = vpop.eup %3005 }
 0x655   :  { %v3008_v34 = vpop.eup %3007  ;;  %896 = vrot.lane.b32.xlu0 %v3006_v33, %s3359_s1 }
 0x656   :  { %792 = vrot.lane.b32.xlu1 %v3008_v34, %s3359_s1  ;;  %v3010_v41 = vpop.eup %3009 }
 0x657   :  { %v3012_v42 = vpop.eup %3011  ;;  %v890_v43 = vadd.f32 1.0, %v3010_v41 }
 0x658   :  { %v783_v45 = vadd.f32 1.0, %v3012_v42 }
 0x659   :  { %3013 = vrcp.f32 %v890_v43 }
 0x65a   :  { %787 = vrot.lane.b32.xlu1 %v3567_v44, %s3359_s1  ;;  %3015 = vrcp.f32 %v783_v45 }
 0x666   :  { %v3014_v47 = vpop.eup %3013 }
 0x667   :  { %v3016_v49 = vpop.eup %3015  ;;  %v894_v53 = vmul.f32 %v3014_v47, %v3592_v62 }
 0x6c7   :  { %v897_v48 = vpop.permute.xlu0 %896 }
 0x6c8   :  { %v899_v50 = vmul.f32 %v3014_v47, %v897_v48  ;;  %v793_v51 = vpop.permute.xlu1 %792 }
 0x6c9   :  { %v795_v52 = vmul.f32 %v3016_v49, %v793_v51 }
 0x6ca   :  { %901 = vrot.lane.b32.xlu1 %v899_v50, %s3361_s2 }
 0x6cb   :  { %797 = vrot.lane.b32.xlu0 %v795_v52, %s3361_s2 }
 0x6cc   :  { %v788_v44 = vpop.permute.xlu1 %787 }
 0x6cd   :  { %v790_v54 = vmul.f32 %v3016_v49, %v788_v44 }
 0x73c   :  { %v902_v55 = vpop.permute.xlu1 %901 }
 0x73d   :  { %v3714_v56 = vadd.f32 %v902_v55, %v894_v53  ;;  %v798_v57 = vpop.permute.xlu0 %797 }
 0x73e   :  { %v3716_v58 = vadd.f32 %v798_v57, %v790_v54 }
 0x73f   :  { %3017 = vtanh.f32 %v3714_v56 }
 0x740   :  { %3019 = vtanh.f32 %v3716_v58 }
 0x74c   :  { %v3018_v59 = vpop.eup %3017 }
 0x74d   :  { %v3020_v60 = vpop.eup %3019  ;;  %907 = vrot.lane.b32.xlu1 %v3018_v59, %s3359_s1 }
 0x74e   :  { %803 = vrot.lane.b32.xlu0 %v3020_v60, %s3359_s1  ;;  %v545_v60 = vadd.f32 %v3687_v19, %v3586_v46 }
 0x7bf   :  { %v908_v61 = vpop.permute.xlu1 %907 }
 0x7c0   :  { %v910_v1 = vmul.f32 %v3014_v47, %v908_v61  ;;  %v804_v62 = vpop.permute.xlu0 %803 }
 0x7c1   :  { %v3722_v2 = vmul.f32 %v3016_v49, %v804_v62 }
 0x7c2   :  { %912 = vrot.lane.b32.xlu0 %v910_v1, %s3361_s2 }
 0x7c3   :  { %916 = vrot.lane.b32.xlu1 %v3722_v2, %s3359_s1 }
 0x834   :  { %v913_v4 = vpop.permute.xlu0 %912 }
 0x835   :  { %2786 = vmatmul.mubr.msk.f32.vlgmr.msra.gmra.mxu1 %vm600_vm6, %v913_v4  ;;  %v917_v6 = vpop.permute.xlu1 %916 }
 0x836   :  { %v919_v8 = vsel %vm600_vm6, %v913_v4, %v917_v6  ;;  %2789 = vmatpush3.msra.mxu1 %v3595_v63  ;;  %2804 = vmatprep.mubr.msk.f32.mxu1 %vm3358_vm0, %v3357_v0 }
 0x837   :  { %2775 = vmatmul.mubr.msk.f32.vlgmr.msra.gmra.mxu0 %vm252_vm4, %v919_v8  ;;  %2790 = vmatprep.subr.mxu1 %v3357_v0 }
 0x838   :  { %2791 = vmatpush3.msra.mxu1 %v3605_v3  ;;  %2808 = vmatpush3.msra.mxu0 %v3534_v35 }
 0x839   :  { %2792 = vmatprep.subr.mxu1 %v3357_v0  ;;  %2809 = vmatprep.subr.mxu0 %v3357_v0 }
 0x83a   :  { %2793 = vmatpush3.msra.mxu1 %v3612_v5  ;;  %2810 = vmatpush3.msra.mxu0 %v3544_v37 }
 0x83b   :  { %2794 = vmatprep.subr.mxu1 %v3357_v0  ;;  %2811 = vmatprep.subr.mxu0 %v3357_v0 }
 0x83c   :  { %2795 = vmatpush3.msra.mxu1 %v3620_v7  ;;  %2812 = vmatpush3.msra.mxu0 %v3553_v38 }
 0x83d   :  { %2796 = vmatprep.subr.mxu1 %v3357_v0  ;;  %2813 = vmatprep.subr.mxu0 %v3357_v0 }
 0x83e   :  { %2797 = vmatpush3.msra.mxu1 %v3628_v9  ;;  %2814 = vmatpush3.msra.mxu0 %v3561_v39 }
 0x83f   :  { %2798 = vmatprep.subr.mxu1 %v3357_v0  ;;  %2815 = vmatprep.mubr.msk.f32.mxu0 %vm3358_vm0, %v3357_v0 }
 0x840   :  { %2799 = vmatpush3.msra.mxu1 %v3636_v11  ;;  %2818 = vmatprep.subr.mxu0 %v3357_v0 }
 0x841   :  { %2800 = vmatprep.subr.mxu1 %v3357_v0 }
 0x842   :  { %2801 = vmatpush3.msra.mxu1 %v3641_v13 }
 0x843   :  { %2802 = vmatprep.subr.mxu1 %v3357_v0 }
 0x844   :  { %2803 = vmatpush3.msra.mxu1 %v3646_v14 }
 0x845   :  { %2837 = vmatprep.subr.mxu1 %v3357_v0 }
 0x8f5   :  { %v1092_v12 = vpop.f32.mrf.mxu1 }
 0x8f6   :  { %v1096_v15 = vadd.f32 %v1092_v12, %v540_v10 }
 0x8f7   :  { %v989_v16 = vpop.f32.mrf.mxu0  ;;  %v2787_v17 = vpop.f32.mrf.mxu1 }
 0x8f8   :  { %3021 = vtanh.f32 %v1096_v15  ;;  %v990_v18 = vadd.f32 %v3704_v26, %v989_v16  ;;  %v2476_v29 = vmul.f32 -1.442695, %v1096_v15 }
 0x8f9   :  { %v2776_v24 = vpop.f32.mrf.mxu0 }
 0x8fa   :  { %3023 = vtanh.f32 %v990_v18  ;;  %v2474_v30 = vmul.f32 -1.442695, %v990_v18 }
 0x8fb   :  { %3025 = vpow2.f32 %v2476_v29 }
 0x8fc   :  { %3027 = vpow2.f32 %v2474_v30 }
 0x905   :  { %v3022_v27 = vpop.eup %3021 }
 0x906   :  { %1106 = vrot.lane.b32.xlu1 %v3022_v27, %s3359_s1 }
 0x907   :  { %v3024_v28 = vpop.eup %3023 }
 0x908   :  { %1002 = vrot.lane.b32.xlu0 %v3024_v28, %s3359_s1  ;;  %v3026_v20 = vpop.eup %3025 }
 0x909   :  { %v3028_v31 = vpop.eup %3027  ;;  %v1100_v32 = vadd.f32 1.0, %v3026_v20 }
 0x90a   :  { %v996_v33 = vadd.f32 1.0, %v3028_v31 }
 0x90b   :  { %3029 = vrcp.f32 %v1100_v32 }
 0x90c   :  { %3031 = vrcp.f32 %v996_v33 }
 0x918   :  { %v3030_v34 = vpop.eup %3029 }
 0x919   :  { %v3032_v41 = vpop.eup %3031  ;;  %v1104_v45 = vmul.f32 %v3030_v34, %v3714_v56 }
 0x91a   :  { %v1000_v49 = vmul.f32 %v3032_v41, %v3716_v58 }
 0x978   :  { %v1107_v36 = vpop.permute.xlu1 %1106 }
 0x979   :  { %v1109_v40 = vmul.f32 %v3030_v34, %v1107_v36 }
 0x97a   :  { %v1003_v42 = vpop.permute.xlu0 %1002 }
 0x97b   :  { %1111 = vrot.lane.b32.xlu1 %v1109_v40, %s3361_s2  ;;  %v1005_v43 = vmul.f32 %v3032_v41, %v1003_v42 }
 0x97d   :  { %1007 = vrot.lane.b32.xlu0 %v1005_v43, %s3361_s2 }
 0x9ed   :  { %v1112_v47 = vpop.permute.xlu1 %1111 }
 0x9ee   :  { %v3766_v48 = vadd.f32 %v1112_v47, %v1104_v45 }
 0x9ef   :  { %v1008_v50 = vpop.permute.xlu0 %1007 }
 0x9f0   :  { %3033 = vtanh.f32 %v3766_v48  ;;  %v3770_v51 = vadd.f32 %v1008_v50, %v1000_v49 }
 0x9f2   :  { %3035 = vtanh.f32 %v3770_v51 }
 0x9fd   :  { %v3034_v52 = vpop.eup %3033 }
 0x9fe   :  { %1117 = vrot.lane.b32.xlu1 %v3034_v52, %s3359_s1 }
 0x9ff   :  { %v3036_v44 = vpop.eup %3035 }
 0xa00   :  { %1013 = vrot.lane.b32.xlu0 %v3036_v44, %s3359_s1  ;;  %v550_v44 = vadd.f32 %v3586_v46, %v3693_v22 }
 0xa70   :  { %v1118_v53 = vpop.permute.xlu1 %1117 }
 0xa71   :  { %v1120_v54 = vmul.f32 %v3030_v34, %v1118_v53 }
 0xa72   :  { %v1014_v55 = vpop.permute.xlu0 %1013 }
 0xa73   :  { %1122 = vrot.lane.b32.xlu0 %v1120_v54, %s3361_s2  ;;  %v3776_v56 = vmul.f32 %v3032_v41, %v1014_v55 }
 0xa75   :  { %1126 = vrot.lane.b32.xlu1 %v3776_v56, %s3359_s1 }
 0xae5   :  { %v1123_v57 = vpop.permute.xlu0 %1122 }
 0xae6   :  { %2816 = vmatmul.mubr.msk.f32.vlgmr.msra.gmra.mxu0 %vm600_vm6, %v1123_v57 }
 0xae7   :  { %2819 = vmatpush3.msra.mxu0 %v3595_v63  ;;  %2834 = vmatprep.mubr.msk.f32.mxu0 %vm3358_vm0, %v3357_v0  ;;  %v1127_v58 = vpop.permute.xlu1 %1126 }
 0xae8   :  { %2820 = vmatprep.subr.mxu0 %v3357_v0  ;;  %v1129_v59 = vsel %vm600_vm6, %v1123_v57, %v1127_v58 }
 0xae9   :  { %2821 = vmatpush3.msra.mxu0 %v3605_v3  ;;  %2805 = vmatmul.mubr.msk.f32.vlgmr.msra.gmra.mxu1 %vm252_vm4, %v1129_v59 }
 0xaea   :  { %2822 = vmatprep.subr.mxu0 %v3357_v0  ;;  %2838 = vmatpush3.msra.mxu1 %v3534_v35 }
 0xaeb   :  { %2823 = vmatpush3.msra.mxu0 %v3612_v5  ;;  %2839 = vmatprep.subr.mxu1 %v3357_v0 }
 0xaec   :  { %2824 = vmatprep.subr.mxu0 %v3357_v0  ;;  %2840 = vmatpush3.msra.mxu1 %v3544_v37 }
 0xaed   :  { %2825 = vmatpush3.msra.mxu0 %v3620_v7  ;;  %2841 = vmatprep.subr.mxu1 %v3357_v0 }
 0xaee   :  { %2826 = vmatprep.subr.mxu0 %v3357_v0  ;;  %2842 = vmatpush3.msra.mxu1 %v3553_v38 }
 0xaef   :  { %2827 = vmatpush3.msra.mxu0 %v3628_v9  ;;  %2843 = vmatprep.subr.mxu1 %v3357_v0 }
 0xaf0   :  { %2828 = vmatprep.subr.mxu0 %v3357_v0  ;;  %2844 = vmatpush3.msra.mxu1 %v3561_v39 }
 0xaf1   :  { %2829 = vmatpush3.msra.mxu0 %v3636_v11  ;;  %2845 = vmatprep.mubr.msk.f32.mxu1 %vm3358_vm0, %v3357_v0 }
 0xaf2   :  { %2830 = vmatprep.subr.mxu0 %v3357_v0  ;;  %2848 = vmatprep.subr.mxu1 %v3357_v0 }
 0xaf3   :  { %2831 = vmatpush3.msra.mxu0 %v3641_v13 }
 0xaf4   :  { %2832 = vmatprep.subr.mxu0 %v3357_v0 }
 0xaf5   :  { %2833 = vmatpush3.msra.mxu0 %v3646_v14 }
 0xaf6   :  { %2867 = vmatprep.subr.mxu0 %v3357_v0 }
 0xba6   :  { %v1302_v61 = vpop.f32.mrf.mxu0 }
 0xba7   :  { %v1306_v1 = vadd.f32 %v1302_v61, %v545_v60 }
 0xba8   :  { %v2817_v62 = vpop.f32.mrf.mxu0 }
 0xba9   :  { %3037 = vtanh.f32 %v1306_v1  ;;  %v1199_v4 = vpop.f32.mrf.mxu1  ;;  %v2480_v15 = vmul.f32 -1.442695, %v1306_v1 }
 0xbaa   :  { %v1200_v6 = vadd.f32 %v3704_v26, %v1199_v4 }
 0xbab   :  { %v2806_v8 = vpop.f32.mrf.mxu1 }
 0xbac   :  { %3039 = vtanh.f32 %v1200_v6  ;;  %v2478_v16 = vmul.f32 -1.442695, %v1200_v6 }
 0xbad   :  { %3041 = vpow2.f32 %v2480_v15 }
 0xbae   :  { %3043 = vpow2.f32 %v2478_v16 }
 0xbb6   :  { %v3038_v10 = vpop.eup %3037 }
 0xbb7   :  { %1316 = vrot.lane.b32.xlu1 %v3038_v10, %s3359_s1 }
 0xbb9   :  { %v3040_v12 = vpop.eup %3039 }
 0xbba   :  { %1212 = vrot.lane.b32.xlu0 %v3040_v12, %s3359_s1  ;;  %v3042_v19 = vpop.eup %3041 }
 0xbbb   :  { %v1310_v17 = vadd.f32 1.0, %v3042_v19  ;;  %v3044_v18 = vpop.eup %3043 }
 0xbbc   :  { %v1206_v24 = vadd.f32 1.0, %v3044_v18 }
 0xbbd   :  { %3045 = vrcp.f32 %v1310_v17 }
 0xbbe   :  { %3047 = vrcp.f32 %v1206_v24 }
 0xbca   :  { %v3046_v27 = vpop.eup %3045 }
 0xbcb   :  { %v3048_v30 = vpop.eup %3047  ;;  %v1314_v32 = vmul.f32 %v3046_v27, %v3766_v48 }
 0xbcc   :  { %v1210_v36 = vmul.f32 %v3048_v30, %v3770_v51 }
 0xc29   :  { %v1317_v28 = vpop.permute.xlu1 %1316 }
 0xc2a   :  { %v1319_v29 = vmul.f32 %v3046_v27, %v1317_v28 }
 0xc2c   :  { %1321 = vrot.lane.b32.xlu1 %v1319_v29, %s3361_s2  ;;  %v1213_v20 = vpop.permute.xlu0 %1212 }
 0xc2d   :  { %v1215_v31 = vmul.f32 %v3048_v30, %v1213_v20 }
 0xc2f   :  { %1217 = vrot.lane.b32.xlu0 %v1215_v31, %s3361_s2 }
 0xc9e   :  { %v1322_v33 = vpop.permute.xlu1 %1321 }
 0xc9f   :  { %v3819_v34 = vadd.f32 %v1322_v33, %v1314_v32 }
 0xca1   :  { %3049 = vtanh.f32 %v3819_v34  ;;  %v1218_v40 = vpop.permute.xlu0 %1217 }
 0xca2   :  { %v3823_v41 = vadd.f32 %v1218_v40, %v1210_v36 }
 0xca4   :  { %3051 = vtanh.f32 %v3823_v41 }
 0xcae   :  { %v3050_v42 = vpop.eup %3049 }
 0xcaf   :  { %1327 = vrot.lane.b32.xlu1 %v3050_v42, %s3359_s1 }
 0xcb1   :  { %v3052_v43 = vpop.eup %3051 }
 0xcb2   :  { %1223 = vrot.lane.b32.xlu0 %v3052_v43, %s3359_s1 }
 0xd21   :  { %v1328_v45 = vpop.permute.xlu1 %1327 }
 0xd22   :  { %v1330_v47 = vmul.f32 %v3046_v27, %v1328_v45 }
 0xd24   :  { %1332 = vrot.lane.b32.xlu0 %v1330_v47, %s3361_s2  ;;  %v1224_v48 = vpop.permute.xlu0 %1223 }
 0xd25   :  { %v3829_v49 = vmul.f32 %v3048_v30, %v1224_v48 }
 0xd27   :  { %1336 = vrot.lane.b32.xlu1 %v3829_v49, %s3359_s1 }
 0xd96   :  { %v1333_v50 = vpop.permute.xlu0 %1332 }
 0xd97   :  { %2846 = vmatmul.mubr.msk.f32.vlgmr.msra.gmra.mxu1 %vm600_vm6, %v1333_v50 }
 0xd98   :  { %2849 = vmatpush3.msra.mxu1 %v3595_v63  ;;  %2864 = vmatprep.mubr.msk.f32.mxu1 %vm3358_vm0, %v3357_v0 }
 0xd99   :  { %2850 = vmatprep.subr.mxu1 %v3357_v0  ;;  %v1337_v51 = vpop.permute.xlu1 %1336 }
 0xd9a   :  { %2851 = vmatpush3.msra.mxu1 %v3605_v3  ;;  %v1339_v52 = vsel %vm600_vm6, %v1333_v50, %v1337_v51 }
 0xd9b   :  { %2852 = vmatprep.subr.mxu1 %v3357_v0  ;;  %2835 = vmatmul.mubr.msk.f32.vlgmr.msra.gmra.mxu0 %vm252_vm4, %v1339_v52 }
 0xd9c   :  { %2853 = vmatpush3.msra.mxu1 %v3612_v5  ;;  %2868 = vmatpush3.msra.mxu0 %v3534_v35 }
 0xd9d   :  { %2854 = vmatprep.subr.mxu1 %v3357_v0  ;;  %2869 = vmatprep.subr.mxu0 %v3357_v0 }
 0xd9e   :  { %2855 = vmatpush3.msra.mxu1 %v3620_v7  ;;  %2870 = vmatpush3.msra.mxu0 %v3544_v37 }
 0xd9f   :  { %2856 = vmatprep.subr.mxu1 %v3357_v0  ;;  %2871 = vmatprep.subr.mxu0 %v3357_v0 }
 0xda0   :  { %2857 = vmatpush3.msra.mxu1 %v3628_v9  ;;  %2872 = vmatpush3.msra.mxu0 %v3553_v38 }
 0xda1   :  { %2858 = vmatprep.subr.mxu1 %v3357_v0  ;;  %2873 = vmatprep.subr.mxu0 %v3357_v0 }
 0xda2   :  { %2875 = vmatprep.mubr.msk.f32.mxu0 %vm3358_vm0, %v3357_v0  ;;  %2874 = vmatpush3.msra.mxu0 %v3561_v39 }
 0xda3   :  { %2859 = vmatpush3.msra.mxu1 %v3636_v11  ;;  %2878 = vmatprep.subr.mxu0 %v3357_v0 }
 0xda4   :  { %2860 = vmatprep.subr.mxu1 %v3357_v0 }
 0xda5   :  { %2861 = vmatpush3.msra.mxu1 %v3641_v13 }
 0xda6   :  { %2862 = vmatprep.subr.mxu1 %v3357_v0 }
 0xda7   :  { %2863 = vmatpush3.msra.mxu1 %v3646_v14 }
 0xda8   :  { %2897 = vmatprep.subr.mxu1 %v3357_v0 }
 0xe57   :  { %v1512_v53 = vpop.f32.mrf.mxu1 }
 0xe58   :  { %v1516_v54 = vadd.f32 %v1512_v53, %v550_v44 }
 0xe59   :  { %v2847_v55 = vpop.f32.mrf.mxu1 }
 0xe5a   :  { %3053 = vtanh.f32 %v1516_v54  ;;  %v2484_v1 = vmul.f32 -1.442695, %v1516_v54 }
 0xe5b   :  { %v1409_v57 = vpop.f32.mrf.mxu0 }
 0xe5c   :  { %v1410_v58 = vadd.f32 %v3704_v26, %v1409_v57 }
 0xe5d   :  { %v2836_v59 = vpop.f32.mrf.mxu0 }
 0xe5e   :  { %3055 = vtanh.f32 %v1410_v58  ;;  %v2482_v62 = vmul.f32 -1.442695, %v1410_v58 }
 0xe5f   :  { %3057 = vpow2.f32 %v2484_v1 }
 0xe60   :  { %3059 = vpow2.f32 %v2482_v62 }
 0xe67   :  { %v3054_v60 = vpop.eup %3053 }
 0xe68   :  { %1526 = vrot.lane.b32.xlu1 %v3054_v60, %s3359_s1 }
 0xe6b   :  { %v3056_v61 = vpop.eup %3055 }
 0xe6c   :  { %1422 = vrot.lane.b32.xlu0 %v3056_v61, %s3359_s1  ;;  %v3058_v22 = vpop.eup %3057 }
 0xe6d   :  { %v1520_v4 = vadd.f32 1.0, %v3058_v22  ;;  %v3060_v6 = vpop.eup %3059 }
 0xe6e   :  { %v1416_v8 = vadd.f32 1.0, %v3060_v6 }
 0xe6f   :  { %3061 = vrcp.f32 %v1520_v4 }
 0xe70   :  { %3063 = vrcp.f32 %v1416_v8 }
 0xe7c   :  { %v3062_v10 = vpop.eup %3061 }
 0xe7d   :  { %v3064_v16 = vpop.eup %3063  ;;  %v1524_v18 = vmul.f32 %v3062_v10, %v3819_v34 }
 0xe7e   :  { %v1420_v28 = vmul.f32 %v3064_v16, %v3823_v41 }
 0xeda   :  { %v1527_v12 = vpop.permute.xlu1 %1526 }
 0xedb   :  { %v1529_v15 = vmul.f32 %v3062_v10, %v1527_v12 }
 0xedd   :  { %1531 = vrot.lane.b32.xlu1 %v1529_v15, %s3361_s2 }
 0xede   :  { %v1423_v19 = vpop.permute.xlu0 %1422 }
 0xedf   :  { %v1425_v17 = vmul.f32 %v3064_v16, %v1423_v19 }
 0xee1   :  { %1427 = vrot.lane.b32.xlu0 %v1425_v17, %s3361_s2 }
 0xf4f   :  { %v1532_v24 = vpop.permute.xlu1 %1531 }
 0xf50   :  { %v3872_v27 = vadd.f32 %v1532_v24, %v1524_v18 }
 0xf52   :  { %3065 = vtanh.f32 %v3872_v27 }
 0xf53   :  { %v1428_v29 = vpop.permute.xlu0 %1427 }
 0xf54   :  { %v3876_v30 = vadd.f32 %v1428_v29, %v1420_v28 }
 0xf56   :  { %3067 = vtanh.f32 %v3876_v30 }
 0xf5f   :  { %v3066_v20 = vpop.eup %3065 }
 0xf60   :  { %1537 = vrot.lane.b32.xlu1 %v3066_v20, %s3359_s1 }
 0xf63   :  { %v3068_v31 = vpop.eup %3067 }
 0xf64   :  { %1433 = vrot.lane.b32.xlu0 %v3068_v31, %s3359_s1 }
 0xfd2   :  { %v1538_v32 = vpop.permute.xlu1 %1537 }
 0xfd3   :  { %v1540_v33 = vmul.f32 %v3062_v10, %v1538_v32 }
 0xfd5   :  { %1542 = vrot.lane.b32.xlu0 %v1540_v33, %s3361_s2 }
 0xfd6   :  { %v1434_v34 = vpop.permute.xlu0 %1433 }
 0xfd7   :  { %v3882_v36 = vmul.f32 %v3064_v16, %v1434_v34 }
 0xfd9   :  { %1546 = vrot.lane.b32.xlu1 %v3882_v36, %s3359_s1 }
0x1047   :  { %v1543_v40 = vpop.permute.xlu0 %1542 }
0x1048   :  { %2876 = vmatmul.mubr.msk.f32.vlgmr.msra.gmra.mxu0 %vm600_vm6, %v1543_v40 }
0x1049   :  { %2879 = vmatpush3.msra.mxu0 %v3595_v63  ;;  %2894 = vmatprep.mubr.msk.f32.mxu0 %vm3358_vm0, %v3357_v0 }
0x104a   :  { %2880 = vmatprep.subr.mxu0 %v3357_v0 }
0x104b   :  { %2881 = vmatpush3.msra.mxu0 %v3605_v3  ;;  %v1547_v41 = vpop.permute.xlu1 %1546 }
0x104c   :  { %2882 = vmatprep.subr.mxu0 %v3357_v0  ;;  %v1549_v42 = vsel %vm600_vm6, %v1543_v40, %v1547_v41 }
0x104d   :  { %2883 = vmatpush3.msra.mxu0 %v3612_v5  ;;  %2865 = vmatmul.mubr.msk.f32.vlgmr.msra.gmra.mxu1 %vm252_vm4, %v1549_v42 }
0x104e   :  { %2884 = vmatprep.subr.mxu0 %v3357_v0  ;;  %2898 = vmatpush3.msra.mxu1 %v3534_v35  ;;  %v555_v35 = vadd.f32 %v3691_v21, %v3586_v46 }
0x104f   :  { %2885 = vmatpush3.msra.mxu0 %v3620_v7  ;;  %2899 = vmatprep.subr.mxu1 %v3357_v0 }
0x1050   :  { %2886 = vmatprep.subr.mxu0 %v3357_v0  ;;  %2900 = vmatpush3.msra.mxu1 %v3544_v37 }
0x1051   :  { %2887 = vmatpush3.msra.mxu0 %v3628_v9  ;;  %2901 = vmatprep.subr.mxu1 %v3357_v0 }
0x1052   :  { %2905 = vmatprep.mubr.msk.f32.mxu1 %vm3358_vm0, %v3357_v0  ;;  %2902 = vmatpush3.msra.mxu1 %v3553_v38 }
0x1053   :  { %2888 = vmatprep.subr.mxu0 %v3357_v0  ;;  %2903 = vmatprep.subr.mxu1 %v3357_v0 }
0x1054   :  { %2889 = vmatpush3.msra.mxu0 %v3636_v11  ;;  %2904 = vmatpush3.msra.mxu1 %v3561_v39 }
0x1055   :  { %2890 = vmatprep.subr.mxu0 %v3357_v0  ;;  %2908 = vmatprep.subr.mxu1 %v3357_v0 }
0x1056   :  { %2891 = vmatpush3.msra.mxu0 %v3641_v13 }
0x1057   :  { %2892 = vmatprep.subr.mxu0 %v3357_v0 }
0x1058   :  { %2893 = vmatpush3.msra.mxu0 %v3646_v14 }
0x1059   :  { %2927 = vmatprep.subr.mxu0 %v3357_v0 }
0x1108   :  { %v1722_v37 = vpop.f32.mrf.mxu0 }
0x1109   :  { %v1726_v38 = vadd.f32 %v1722_v37, %v555_v35 }
0x110a   :  { %v2877_v43 = vpop.f32.mrf.mxu0 }
0x110b   :  { %3069 = vtanh.f32 %v1726_v38  ;;  %v2488_v51 = vmul.f32 -1.442695, %v1726_v38 }
0x110d   :  { %v1619_v39 = vpop.f32.mrf.mxu1 }
0x110e   :  { %v1620_v45 = vadd.f32 %v3704_v26, %v1619_v39 }
0x110f   :  { %v2866_v47 = vpop.f32.mrf.mxu1 }
0x1110   :  { %3071 = vtanh.f32 %v1620_v45  ;;  %v2486_v52 = vmul.f32 -1.442695, %v1620_v45 }
0x1111   :  { %3073 = vpow2.f32 %v2488_v51 }
0x1112   :  { %3075 = vpow2.f32 %v2486_v52 }
0x1118   :  { %v3070_v48 = vpop.eup %3069 }
0x1119   :  { %1736 = vrot.lane.b32.xlu1 %v3070_v48, %s3359_s1 }
0x111d   :  { %v3072_v50 = vpop.eup %3071 }
0x111e   :  { %1632 = vrot.lane.b32.xlu0 %v3072_v50, %s3359_s1  ;;  %v3074_v21 = vpop.eup %3073 }
0x111f   :  { %v1730_v44 = vadd.f32 1.0, %v3074_v21  ;;  %v3076_v53 = vpop.eup %3075 }
0x1120   :  { %v1626_v54 = vadd.f32 1.0, %v3076_v53 }
0x1121   :  { %3077 = vrcp.f32 %v1730_v44 }
0x1122   :  { %3079 = vrcp.f32 %v1626_v54 }
0x112e   :  { %v3078_v55 = vpop.eup %3077 }
0x112f   :  { %v3080_v59 = vpop.eup %3079  ;;  %v1734_v1 = vmul.f32 %v3078_v55, %v3872_v27 }
0x1130   :  { %v1630_v4 = vmul.f32 %v3080_v59, %v3876_v30 }
0x118b   :  { %v1737_v57 = vpop.permute.xlu1 %1736 }
0x118c   :  { %v1739_v58 = vmul.f32 %v3078_v55, %v1737_v57 }
0x118e   :  { %1741 = vrot.lane.b32.xlu1 %v1739_v58, %s3361_s2  ;;  %v3145_v58 = vld [vmem:[#allocation15 + $0x38] sm:$0xff] }
0x1190   :  { %v1633_v60 = vpop.permute.xlu0 %1632 }
0x1191   :  { %v1635_v61 = vmul.f32 %v3080_v59, %v1633_v60  ;;  %v3147_v60 = vld [vmem:[#allocation15 + $0x28] sm:$0xff] }
0x1193   :  { %1637 = vrot.lane.b32.xlu0 %v1635_v61, %s3361_s2 }
0x1200   :  { %v1742_v62 = vpop.permute.xlu1 %1741 }
0x1201   :  { %v3925_v22 = vadd.f32 %v1742_v62, %v1734_v1  ;;  %v3148_v62 = vld [vmem:[#allocation15 + $0x20] sm:$0xff] }
0x1203   :  { %3081 = vtanh.f32 %v3925_v22 }
0x1205   :  { %v1638_v6 = vpop.permute.xlu0 %1637 }
0x1206   :  { %v3929_v8 = vadd.f32 %v1638_v6, %v1630_v4  ;;  %v3150_v4 = vld [vmem:[#allocation15 + $0x10] sm:$0xff]  ;;  %v3151_v6 = vld [vmem:[#allocation15 + $0x8] sm:$0xff] }
0x1208   :  { %3083 = vtanh.f32 %v3929_v8 }
0x1210   :  { %v3082_v10 = vpop.eup %3081 }
0x1211   :  { %1747 = vrot.lane.b32.xlu1 %v3082_v10, %s3359_s1  ;;  %v3153_v10 = vld [vmem:[%s4080_s10] ss:$0 sm:$0xff] }
0x1215   :  { %v3084_v12 = vpop.eup %3083 }
0x1216   :  { %1643 = vrot.lane.b32.xlu0 %v3084_v12, %s3359_s1  ;;  %v565_v12 = vadd.f32 %v3153_v10, %v3695_v23 }
0x1283   :  { %v1748_v15 = vpop.permute.xlu1 %1747 }
0x1284   :  { %v1750_v16 = vmul.f32 %v3078_v55, %v1748_v15 }
0x1286   :  { %1752 = vrot.lane.b32.xlu0 %v1750_v16, %s3361_s2 }
0x1288   :  { %v1644_v19 = vpop.permute.xlu0 %1643 }
0x1289   :  { %v3935_v17 = vmul.f32 %v3080_v59, %v1644_v19  ;;  %v3146_v59 = vld [vmem:[#allocation15 + $0x30] sm:$0xff] }
0x128b   :  { %1756 = vrot.lane.b32.xlu1 %v3935_v17, %s3359_s1 }
0x12f8   :  { %v1753_v18 = vpop.permute.xlu0 %1752 }
0x12f9   :  { %2906 = vmatmul.mubr.msk.f32.vlgmr.msra.gmra.mxu1 %vm600_vm6, %v1753_v18 }
0x12fa   :  { %2909 = vmatpush3.msra.mxu1 %v3595_v63  ;;  %2924 = vmatprep.mubr.msk.f32.mxu1 %vm3358_vm0, %v3357_v0  ;;  %v3141_v63 = vld [vmem:[%s4079_s9 + $0x18] sm:$0xff] }
0x12fb   :  { %2910 = vmatprep.subr.mxu1 %v3357_v0 }
0x12fc   :  { %2911 = vmatpush3.msra.mxu1 %v3605_v3  ;;  %v3142_v3 = vld [vmem:[%s4079_s9 + $0x10] sm:$0xff] }
0x12fd   :  { %2912 = vmatprep.subr.mxu1 %v3357_v0  ;;  %v1757_v24 = vpop.permute.xlu1 %1756 }
0x12fe   :  { %2913 = vmatpush3.msra.mxu1 %v3612_v5  ;;  %v1759_v27 = vsel %vm600_vm6, %v1753_v18, %v1757_v24  ;;  %v3143_v5 = vld [vmem:[%s4079_s9 + $0x8] sm:$0xff] }
0x12ff   :  { %2914 = vmatprep.subr.mxu1 %v3357_v0  ;;  %2895 = vmatmul.mubr.msk.f32.vlgmr.msra.gmra.mxu0 %vm252_vm4, %v1759_v27 }
0x1300   :  { %2915 = vmatpush3.msra.mxu1 %v3620_v7  ;;  %2928 = vmatpush3.msra.mxu0 %v3141_v63  ;;  %v3144_v7 = vld [vmem:[%s4079_s9] sm:$0xff] }
0x1301   :  { %2916 = vmatprep.subr.mxu1 %v3357_v0  ;;  %2929 = vmatprep.subr.mxu0 %v3357_v0 }
0x1302   :  { %2935 = vmatprep.mubr.msk.f32.mxu0 %vm3358_vm0, %v3357_v0  ;;  %2930 = vmatpush3.msra.mxu0 %v3142_v3 }
0x1303   :  { %2917 = vmatpush3.msra.mxu1 %v3628_v9  ;;  %2931 = vmatprep.subr.mxu0 %v3357_v0  ;;  %v560_v9 = vadd.f32 %v3586_v46, %v3699_v25 }
0x1304   :  { %2918 = vmatprep.subr.mxu1 %v3357_v0  ;;  %2932 = vmatpush3.msra.mxu0 %v3143_v5 }
0x1305   :  { %2919 = vmatpush3.msra.mxu1 %v3636_v11  ;;  %2933 = vmatprep.subr.mxu0 %v3357_v0 }
0x1306   :  { %2920 = vmatprep.subr.mxu1 %v3357_v0  ;;  %2934 = vmatpush3.msra.mxu0 %v3144_v7 }
0x1307   :  { %2921 = vmatpush3.msra.mxu1 %v3641_v13  ;;  %2938 = vmatprep.subr.mxu0 %v3357_v0 }
0x1308   :  { %2922 = vmatprep.subr.mxu1 %v3357_v0 }
0x1309   :  { %2923 = vmatpush3.msra.mxu1 %v3646_v14 }
0x13b9   :  { %v1932_v11 = vpop.f32.mrf.mxu1 }
0x13ba   :  { %v1936_v28 = vadd.f32 %v1932_v11, %v560_v9 }
0x13bb   :  { %v2907_v29 = vpop.f32.mrf.mxu1 }
0x13bc   :  { %3085 = vtanh.f32 %v1936_v28  ;;  %v2492_v33 = vmul.f32 -1.442695, %v1936_v28 }
0x13bf   :  { %v1829_v30 = vpop.f32.mrf.mxu0 }
0x13c0   :  { %v1830_v20 = vadd.f32 %v3704_v26, %v1829_v30 }
0x13c1   :  { %v2896_v31 = vpop.f32.mrf.mxu0 }
0x13c2   :  { %3087 = vtanh.f32 %v1830_v20  ;;  %v2490_v14 = vmul.f32 -1.442695, %v1830_v20 }
0x13c3   :  { %3089 = vpow2.f32 %v2492_v33 }
0x13c4   :  { %3091 = vpow2.f32 %v2490_v14 }
0x13c9   :  { %v3086_v32 = vpop.eup %3085 }
0x13ca   :  { %1946 = vrot.lane.b32.xlu1 %v3086_v32, %s3359_s1 }
0x13cf   :  { %v3088_v13 = vpop.eup %3087 }
0x13d0   :  { %1842 = vrot.lane.b32.xlu0 %v3088_v13, %s3359_s1  ;;  %v3090_v46 = vpop.eup %3089 }
0x13d1   :  { %v1940_v25 = vadd.f32 1.0, %v3090_v46  ;;  %v3092_v34 = vpop.eup %3091 }
0x13d2   :  { %v1836_v40 = vadd.f32 1.0, %v3092_v34 }
0x13d3   :  { %3093 = vrcp.f32 %v1940_v25 }
0x13d4   :  { %3095 = vrcp.f32 %v1836_v40 }
0x13e0   :  { %v3094_v41 = vpop.eup %3093 }
0x13e1   :  { %v3096_v37 = vpop.eup %3095  ;;  %v1944_v39 = vmul.f32 %v3094_v41, %v3925_v22  ;;  %v3149_v22 = vld [vmem:[#allocation15 + $0x18] sm:$0xff] }
0x13e2   :  { %v1840_v48 = vmul.f32 %v3096_v37, %v3929_v8  ;;  %v3152_v8 = vld [vmem:[#allocation15] sm:$0xff] }
0x143c   :  { %v1947_v42 = vpop.permute.xlu1 %1946 }
0x143d   :  { %v1949_v35 = vmul.f32 %v3094_v41, %v1947_v42 }
0x143f   :  { %1951 = vrot.lane.b32.xlu1 %v1949_v35, %s3361_s2 }
0x1442   :  { %v1843_v38 = vpop.permute.xlu0 %1842 }
0x1443   :  { %v1845_v43 = vmul.f32 %v3096_v37, %v1843_v38 }
0x1445   :  { %1847 = vrot.lane.b32.xlu0 %v1845_v43, %s3361_s2 }
0x14b1   :  { %v1952_v45 = vpop.permute.xlu1 %1951 }
0x14b2   :  { %v3985_v47 = vadd.f32 %v1952_v45, %v1944_v39 }
0x14b4   :  { %3097 = vtanh.f32 %v3985_v47 }
0x14b7   :  { %v1848_v50 = vpop.permute.xlu0 %1847 }
0x14b8   :  { %v3989_v51 = vadd.f32 %v1848_v50, %v1840_v48 }
0x14ba   :  { %3099 = vtanh.f32 %v3989_v51 }
0x14c1   :  { %v3098_v52 = vpop.eup %3097 }
0x14c2   :  { %1957 = vrot.lane.b32.xlu1 %v3098_v52, %s3359_s1 }
0x14c7   :  { %v3100_v21 = vpop.eup %3099 }
0x14c8   :  { %1853 = vrot.lane.b32.xlu0 %v3100_v21, %s3359_s1 }
0x1534   :  { %v1958_v44 = vpop.permute.xlu1 %1957 }
0x1535   :  { %v1960_v53 = vmul.f32 %v3094_v41, %v1958_v44 }
0x1537   :  { %1962 = vrot.lane.b32.xlu0 %v1960_v53, %s3361_s2 }
0x153a   :  { %v1854_v54 = vpop.permute.xlu0 %1853 }
0x153b   :  { %v3995_v55 = vmul.f32 %v3096_v37, %v1854_v54 }
0x153d   :  { %1966 = vrot.lane.b32.xlu1 %v3995_v55, %s3359_s1 }
0x15a9   :  { %v1963_v57 = vpop.permute.xlu0 %1962 }
0x15aa   :  { %2936 = vmatmul.mubr.msk.f32.vlgmr.msra.gmra.mxu0 %vm600_vm6, %v1963_v57 }
0x15ab   :  { %2939 = vmatpush3.msra.mxu0 %v3145_v58  ;;  %2954 = vmatprep.mubr.msk.f32.mxu0 %vm3358_vm0, %v3357_v0 }
0x15ac   :  { %2940 = vmatprep.subr.mxu0 %v3357_v0 }
0x15ad   :  { %2941 = vmatpush3.msra.mxu0 %v3146_v59 }
0x15ae   :  { %2942 = vmatprep.subr.mxu0 %v3357_v0 }
0x15af   :  { %2943 = vmatpush3.msra.mxu0 %v3147_v60  ;;  %v1967_v61 = vpop.permute.xlu1 %1966 }
0x15b0   :  { %2944 = vmatprep.subr.mxu0 %v3357_v0  ;;  %v1969_v1 = vsel %vm600_vm6, %v1963_v57, %v1967_v61 }
0x15b1   :  { %2945 = vmatpush3.msra.mxu0 %v3148_v62  ;;  %2925 = vmatmul.mubr.msk.f32.vlgmr.msra.gmra.mxu1 %vm252_vm4, %v1969_v1  ;;  %v598_v62 = vld [vmem:[#allocation16 + $0x18] sm:$0xff] }
0x15b2   :  { %2946 = vmatprep.subr.mxu0 %v3357_v0  ;;  %2957 = vmatprep.subr.mxu1 %v598_v62 }
0x15b3   :  { %2947 = vmatpush3.msra.mxu0 %v3149_v22  ;;  %2958 = vmatpush3.msra.mxu1 %v598_v62 }
0x15b4   :  { %2948 = vmatprep.subr.mxu0 %v3357_v0 }
0x15b5   :  { %2949 = vmatpush3.msra.mxu0 %v3150_v4  ;;  %v597_v4 = vld [vmem:[#allocation16 + $0x10] sm:$0xff] }
0x15b6   :  { %2950 = vmatprep.subr.mxu0 %v3357_v0  ;;  %2959 = vmatprep.subr.mxu1 %v597_v4 }
0x15b7   :  { %2951 = vmatpush3.msra.mxu0 %v3151_v6  ;;  %2960 = vmatpush3.msra.mxu1 %v597_v4  ;;  %v596_v6 = vld [vmem:[#allocation16 + $0x8] sm:$0xff] }
0x15b8   :  { %2952 = vmatprep.subr.mxu0 %v3357_v0  ;;  %2961 = vmatprep.subr.mxu1 %v596_v6 }
0x15b9   :  { %2953 = vmatpush3.msra.mxu0 %v3152_v8  ;;  %2962 = vmatpush3.msra.mxu1 %v596_v6 }
0x166a   :  { %v2142_v15 = vpop.f32.mrf.mxu0 }
0x166b   :  { %v2146_v16 = vadd.f32 %v2142_v15, %v565_v12  ;;  %v595_v12 = vld [vmem:[#allocation16] sm:$0xff] }
0x166c   :  { %v2937_v19 = vpop.f32.mrf.mxu0  ;;  %2963 = vmatprep.subr.mxu1 %v595_v12 }
0x166d   :  { %3101 = vtanh.f32 %v2146_v16  ;;  %v2496_v3 = vmul.f32 -1.442695, %v2146_v16  ;;  %2964 = vmatpush3.msra.mxu1 %v595_v12 }
0x1671   :  { %v2039_v18 = vpop.f32.mrf.mxu1 }
0x1672   :  { %v2040_v24 = vadd.f32 %v3704_v26, %v2039_v18 }
0x1673   :  { %v2926_v27 = vpop.f32.mrf.mxu1 }
0x1674   :  { %3103 = vtanh.f32 %v2040_v24  ;;  %v2494_v5 = vmul.f32 -1.442695, %v2040_v24 }
0x1675   :  { %3105 = vpow2.f32 %v2496_v3 }
0x1676   :  { %3107 = vpow2.f32 %v2494_v5 }
0x167a   :  { %v3102_v63 = vpop.eup %3101 }
0x167b   :  { %2156 = vrot.lane.b32.xlu1 %v3102_v63, %s3359_s1 }
0x1681   :  { %v3104_v0 = vpop.eup %3103 }
0x1682   :  { %2052 = vrot.lane.b32.xlu0 %v3104_v0, %s3359_s1  ;;  %v3106_v23 = vpop.eup %3105 }
0x1683   :  { %v2150_v7 = vadd.f32 1.0, %v3106_v23  ;;  %v3108_v9 = vpop.eup %3107 }
0x1684   :  { %v2046_v11 = vadd.f32 1.0, %v3108_v9 }
0x1685   :  { %3109 = vrcp.f32 %v2150_v7 }
0x1686   :  { %3111 = vrcp.f32 %v2046_v11 }
0x1692   :  { %v3110_v28 = vpop.eup %3109 }
0x1693   :  { %v3112_v30 = vpop.eup %3111  ;;  %v2154_v32 = vmul.f32 %v3110_v28, %v3985_v47  ;;  %v3154_v47 = vld [vmem:[%s4082_s12] ss:$0 sm:$0xff]  ;;  %s3362_s12 = smov [#allocation18]  }
0x1694   :  { %v2050_v14 = vmul.f32 %v3112_v30, %v3989_v51 }
0x16ed   :  { %v2157_v26 = vpop.permute.xlu1 %2156 }
0x16ee   :  { %v2159_v29 = vmul.f32 %v3110_v28, %v2157_v26 }
0x16f0   :  { %2161 = vrot.lane.b32.xlu1 %v2159_v29, %s3361_s2 }
0x16f4   :  { %v2053_v20 = vpop.permute.xlu0 %2052 }
0x16f5   :  { %v2055_v31 = vmul.f32 %v3112_v30, %v2053_v20 }
0x16f7   :  { %2057 = vrot.lane.b32.xlu0 %v2055_v31, %s3361_s2 }
0x1762   :  { %v2162_v13 = vpop.permute.xlu1 %2161 }
0x1763   :  { %v2164_v33 = vadd.f32 %v2162_v13, %v2154_v32 }
0x1765   :  { %3113 = vtanh.f32 %v2164_v33 }
0x1769   :  { %v2058_v46 = vpop.permute.xlu0 %2057 }
0x176a   :  { %v2060_v25 = vadd.f32 %v2058_v46, %v2050_v14 }
0x176c   :  { %3115 = vtanh.f32 %v2060_v25 }
0x1772   :  { %v3114_v34 = vpop.eup %3113 }
0x1773   :  { %2167 = vrot.lane.b32.xlu1 %v3114_v34, %s3359_s1 }
0x1779   :  { %v3116_v40 = vpop.eup %3115 }
0x177a   :  { %2063 = vrot.lane.b32.xlu0 %v3116_v40, %s3359_s1 }
0x17e5   :  { %v2168_v41 = vpop.permute.xlu1 %2167 }
0x17e6   :  { %v2170_v42 = vmul.f32 %v3110_v28, %v2168_v41 }
0x17e8   :  { %2172 = vrot.lane.b32.xlu0 %v2170_v42, %s3361_s2 }
0x17ec   :  { %v2064_v35 = vpop.permute.xlu0 %2063 }
0x17ed   :  { %v2066_v37 = vmul.f32 %v3112_v30, %v2064_v35 }
0x17ef   :  { %2176 = vrot.lane.b32.xlu1 %v2066_v37, %s3359_s1 }
0x185a   :  { %v2173_v38 = vpop.permute.xlu0 %2172 }
0x1861   :  { %v2177_v43 = vpop.permute.xlu1 %2176 }
0x1862   :  { %v2179_v39 = vsel %vm600_vm6, %v2173_v38, %v2177_v43 }
0x1863   :  { %2955 = vmatmul.mubr.msk.f32.vlgmr.msra.gmra.mxu0 %vm252_vm4, %v2179_v39 }
0x1923   :  { %v2249_v45 = vpop.f32.mrf.mxu0 }
0x1924   :  { %v2250_v48 = vadd.f32 %v3154_v47, %v2249_v45 }
0x1925   :  { %v2956_v50 = vpop.f32.mrf.mxu0 }
0x1926   :  { %3117 = vtanh.f32 %v2250_v48  ;;  %v2498_v52 = vmul.f32 -1.442695, %v2250_v48 }
0x1928   :  { %3119 = vpow2.f32 %v2498_v52 }
0x1933   :  { %v3118_v51 = vpop.eup %3117 }
0x1934   :  { %2262 = vrot.lane.b32.xlu0 %v3118_v51, %s3359_s1 }
0x1935   :  { %v3120_v21 = vpop.eup %3119 }
0x1936   :  { %v2256_v44 = vadd.f32 1.0, %v3120_v21 }
0x1938   :  { %3121 = vrcp.f32 %v2256_v44 }
0x1939   :  { %3123 = vtanh.f32 %v3722_v2 }
0x193a   :  { %3125 = vtanh.f32 %v3829_v49 }
0x193b   :  { %3127 = vtanh.f32 %v3935_v17 }
0x193c   :  { %3129 = vtanh.f32 %v2066_v37 }
0x1945   :  { %v3122_v53 = vpop.eup %3121 }
0x1946   :  { %v3124_v58 = vpop.eup %3123  ;;  %v2260_v49 = vmul.f32 %v3122_v53, %v2060_v25 }
0x1947   :  { %v3126_v59 = vpop.eup %3125 }
0x1948   :  { %v3128_v60 = vpop.eup %3127 }
0x1949   :  { %v3130_v2 = vpop.eup %3129 }
0x19a6   :  { %v2263_v54 = vpop.permute.xlu0 %2262 }
0x19a7   :  { %v2265_v57 = vmul.f32 %v3122_v53, %v2263_v54 }
0x19a9   :  { %2267 = vrot.lane.b32.xlu1 %v2265_v57, %s3361_s2 }
0x19ad   :  { %809 = vrot.lane.b32.xlu1 %v3124_v58, %s3361_s2 }
0x19b1   :  { %1229 = vrot.lane.b32.xlu1 %v3126_v59, %s3361_s2 }
0x19b5   :  { %1649 = vrot.lane.b32.xlu1 %v3128_v60, %s3361_s2 }
0x19b9   :  { %2069 = vrot.lane.b32.xlu1 %v3130_v2, %s3361_s2 }
0x1a1b   :  { %v2268_v61 = vpop.permute.xlu1 %2267 }
0x1a1c   :  { %v2270_v1 = vadd.f32 %v2268_v61, %v2260_v49 }
0x1a1e   :  { %3131 = vtanh.f32 %v2270_v1 }
0x1a1f   :  { %v810_v17 = vpop.permute.xlu1 %809  ;;  %3133 = vtanh.f32 %v3776_v56 }
0x1a20   :  { %812 = vst.msk [vmem:[#allocation3] sm:$0xff] %vm600_vm6, %v810_v17  ;;  %3135 = vtanh.f32 %v3882_v36 }
0x1a21   :  { %3137 = vtanh.f32 %v3995_v55 }
0x1a23   :  { %v1230_v22 = vpop.permute.xlu1 %1229 }
0x1a24   :  { %1232 = vst.msk [vmem:[#allocation3 + $0x10] sm:$0xff] %vm600_vm6, %v1230_v22 }
0x1a27   :  { %v1650_v8 = vpop.permute.xlu1 %1649  ;;  %v2283_v10 = vld [vmem:[#allocation3] sm:$0xff] }
0x1a28   :  { %1652 = vst.msk [vmem:[#allocation3 + $0x20] sm:$0xff] %vm600_vm6, %v1650_v8  ;;  %2965 = vmatprep.mubr.msk.f32.mxu1 %vm600_vm6, %v2283_v10 }
0x1a2b   :  { %v3132_v56 = vpop.eup %3131  ;;  %v2070_v15 = vpop.permute.xlu1 %2069  ;;  %v2285_v3 = vld [vmem:[#allocation3 + $0x10] sm:$0xff] }
0x1a2c   :  { %2072 = vst.msk [vmem:[#allocation3 + $0x30] sm:$0xff] %vm600_vm6, %v2070_v15  ;;  %2273 = vrot.lane.b32.xlu0 %v3132_v56, %s3359_s1  ;;  %v3134_v36 = vpop.eup %3133  ;;  %s2433_s1 = sshll.u32 %s3362_s12, 4  ;;  %s2434_s1 = int_to_ptr.vmem [resolvable:$true] %s2433_s1 }
0x1a2d   :  { %v3136_v16 = vpop.eup %3135  ;;  %p3320_p13 = scmp.lt.s32.totalorder %s2434_s1, %s2434_s1 }
0x1a2e   :  { %v3138_v19 = vpop.eup %3137 }
0x1a2f   :  { %v2287_v7 = vld [vmem:[#allocation3 + $0x20] sm:$0xff] }
0x1a30   :  { %1019 = vrot.lane.b32.xlu0 %v3134_v36, %s3361_s2 }
0x1a33   :  { %v2289_v11 = vld [vmem:[#allocation3 + $0x30] sm:$0xff] }
0x1a34   :  { %1439 = vrot.lane.b32.xlu0 %v3136_v16, %s3361_s2 }
0x1a38   :  { %1859 = vrot.lane.b32.xlu0 %v3138_v19, %s3361_s2 }
0x1a9e   :  { %v2274_v18 = vpop.permute.xlu0 %2273 }
0x1a9f   :  { %v2276_v24 = vmul.f32 %v3122_v53, %v2274_v18 }
0x1aa1   :  { %3139 = vtanh.f32 %v2276_v24 }
0x1aa2   :  { %v1020_v55 = vpop.permute.xlu0 %1019 }
0x1aa3   :  { %1022 = vst.msk [vmem:[#allocation3 + $0x8] sm:$0xff] %vm600_vm6, %v1020_v55 }
0x1aa6   :  { %v1440_v27 = vpop.permute.xlu0 %1439 }
0x1aa7   :  { %1442 = vst.msk [vmem:[#allocation3 + $0x18] sm:$0xff] %vm600_vm6, %v1440_v27 }
0x1aaa   :  { %v1860_v63 = vpop.permute.xlu0 %1859  ;;  %v2284_v0 = vld [vmem:[#allocation3 + $0x8] sm:$0xff] }
0x1aab   :  { %1862 = vst.msk [vmem:[#allocation3 + $0x28] sm:$0xff] %vm600_vm6, %v1860_v63  ;;  %2966 = vmatmul.mubr.msk.f32.vlgmr.msra.gmra.mxu1 %vm600_vm6, %v2284_v0 }
0x1aac   :  { %2968 = vmatprep.mubr.msk.f32.mxu1 %vm600_vm6, %v2285_v3 }
0x1aae   :  { %v3140_v5 = vpop.eup %3139  ;;  %v2286_v23 = vld [vmem:[#allocation3 + $0x18] sm:$0xff] }
0x1aaf   :  { %2279 = vrot.lane.b32.xlu0 %v3140_v5, %s3361_s2  ;;  %2969 = vmatmul.mubr.msk.f32.gmra.mxu1 %vm600_vm6, %v2286_v23  ;;  %s3315_s2 = scalar_lea.vmem %s2434_s1, 1024 }
0x1ab0   :  { %2971 = vmatprep.mubr.msk.f32.mxu1 %vm600_vm6, %v2287_v7  ;;  %p3316_p12 = scmp.ne.s32.totalorder %s2434_s1, %s3315_s2  ;;  %p3321_p0 = scmp.lt.s32.totalorder %s3315_s2, %s3315_s2 }
0x1ab2   :  { %v2288_v9 = vld [vmem:[#allocation3 + $0x28] sm:$0xff]  ;;  %p3322_p1 = por %p3321_p0, %p3320_p13 }
0x1ab3   :  { %2972 = vmatmul.mubr.msk.f32.gmra.mxu1 %vm600_vm6, %v2288_v9 }
0x1ab4   :  { %2974 = vmatprep.mubr.msk.f32.mxu1 %vm600_vm6, %v2289_v11  ;;  %p3323_p2 = pnand %p3322_p1, %p3316_p12 }
0x1b21   :  { %v2280_v28 = vpop.permute.xlu0 %2279 }
0x1b22   :  { %2282 = vst.msk [vmem:[#allocation3 + $0x38] sm:$0xff] %vm600_vm6, %v2280_v28 }
0x1b29   :  { %v2290_v26 = vld [vmem:[#allocation3 + $0x38] sm:$0xff] }
0x1b2a   :  { %2975 = vmatmul.mubr.msk.f32.gmra.mxu1 %vm600_vm6, %v2290_v26 }
0x1b6b   :  { %v2967_v29 = vpop.f32.mrf.mxu1 }
0x1b6c   :  { %2421 = vst [vmem:[#allocation18 + $0x8] sm:$0xff] %v2967_v29 }
0x1b6d   :  { %v2381_v30 = vpop.f32.mrf.mxu1 }
0x1b6e   :  { %2420 = vst [vmem:[#allocation18] sm:$0xff] %v2381_v30 }
0x1b6f   :  { %v2970_v20 = vpop.f32.mrf.mxu1 }
0x1b70   :  { %2423 = vst [vmem:[#allocation18 + $0x18] sm:$0xff] %v2970_v20 }
0x1b71   :  { %v2391_v31 = vpop.f32.mrf.mxu1 }
0x1b72   :  { %2422 = vst [vmem:[#allocation18 + $0x10] sm:$0xff] %v2391_v31 }
0x1b73   :  { %v2973_v32 = vpop.f32.mrf.mxu1 }
0x1b74   :  { %2425 = vst [vmem:[#allocation18 + $0x28] sm:$0xff] %v2973_v32 }
0x1b75   :  { %v2401_v13 = vpop.f32.mrf.mxu1 }
0x1b76   :  { %2424 = vst [vmem:[#allocation18 + $0x20] sm:$0xff] %v2401_v13 }
0x1bea   :  { %v2976_v33 = vpop.f32.mrf.mxu1 }
0x1beb   :  { %2427 = vst [vmem:[#allocation18 + $0x38] sm:$0xff] %v2976_v33 }
0x1bec   :  { %v2411_v14 = vpop.f32.mrf.mxu1 }
0x1bed   :  { %2426 = vst [vmem:[#allocation18 + $0x30] sm:$0xff] %v2411_v14 }
0x1bee   :  { %3326 = shalt.err (!%p3323_p2)
}
0x1bef   :  { %2439 = dma.vmem_to_hbm [thread:$0]  %s2434_s1, 1024, %s4084_s14, [#allocation6], %s3349_s22, %s3349_s22, %s3350_s23  }
0x1bf0   :  { %3345 = dma.done.wait [#allocation6], 1024  }
0x1bf1   :  { %3346 = vsyncadd [#allocation6], 4294966272 }
0x1bf2   :  { %2443 = vsyncpa [#allocation5], 1 }
0x1bf3   :  { %2444 = vsyncpa [#allocation8], 1 }
0x1bf4   :  { %2445 = vsyncpa [#allocation11], 1 }
0x1bf5   :  { %2446 = vsyncpa [#allocation14], 1 }
0x1bf6   :  { %2447 = vsyncpa [#allocation17], 1 }
0x1bf7   :  { %2448 = vsyncpa [#allocation6], 1 }

</bundles_post_ra>
